<compile_context>
chip_gen: v5e
topology: v5e:2x2
jax: 0.10.0
libtpu: 0.0.40
codegen_flags: <defaults>
</compile_context>

<pallas_src>
import functools
import numpy as np
import jax
import jax.numpy as jnp
from jax import lax
from jax.experimental import pallas as pl
from jax.experimental.pallas import tpu as pltpu

SUBLANES = 8     # pad batch to this
OUT_LANES = 128  # lane-dense logits / token buffer width


def _use_term_kernel(ctx_ref, w_fused_ref, w_out_ref, b_out_ref, tok_ref, *,
                     vocab, max_len):
    batch_p, d_model = ctx_ref.shape          # [8, 32]
    k_total = w_fused_ref.shape[0]            # 128 (vocab + d_model + step seg)
    out_cols = tok_ref.shape[1]               # 128
    step_seg = k_total - vocab - d_model      # 64 (lanes for the step one-hot)

    # ---- hoist all loop-invariant weights out of the serial loop ----
    w_fused = w_fused_ref[...]                # bf16 [128, 4*d_model]
    w_out = w_out_ref[...]                    # bf16 [d_model, 128]
    b_out = b_out_ref[...]                    # f32  [batch_p, 128] (pre-broadcast)

    # hoisted iotas (JAX does not CSE broadcasts inside the loop)
    v_iota = lax.broadcasted_iota(jnp.int32, (batch_p, vocab), 1)
    s_iota = lax.broadcasted_iota(jnp.int32, (batch_p, step_seg), 1)
    o_iota = lax.broadcasted_iota(jnp.int32, (batch_p, out_cols), 1)

    h0 = ctx_ref[...]                                  # hidden = context
    c0 = jnp.zeros((batch_p, d_model), jnp.float32)    # cell   = zeros
    tok0 = jnp.zeros((batch_p, 1), jnp.int32)          # start token = 0
    buf0 = jnp.zeros((batch_p, out_cols), jnp.int32)   # token buffer (lane-dense)

    def step_fn(step, carry):
        h, c, cur_tok, toks = carry

        # ---- entire input + hidden + positional-bias path in ONE bf16 matmul:
        #      LHS = [one_hot(token) | h | one_hot(step) | 0...]  -> [8, 128]
        one_hot = (v_iota == cur_tok).astype(jnp.float32)          # [B, V]
        step_oh = (s_iota == step).astype(jnp.float32)             # [B, 64]
        lhs = jnp.concatenate([one_hot, h, step_oh],
                              axis=-1).astype(jnp.bfloat16)        # [B, 128]
        gates = jnp.dot(lhs, w_fused,
                        preferred_element_type=jnp.float32)        # [B, 4D]

        # gate order in fused weight: i, f, o (sigmoid) | g (tanh)
        sig = jax.nn.sigmoid(gates[:, :3 * d_model])               # [B, 3D]
        g_g = jnp.tanh(gates[:, 3 * d_model:])                     # [B, D]
        i_g = sig[:, :d_model]
        f_g = sig[:, d_model:2 * d_model]
        o_g = sig[:, 2 * d_model:]
        c_new = f_g * c + i_g * g_g
        h_new = o_g * jnp.tanh(c_new)

        # ---- lane-dense output projection + argmax (first-max, like torch) ----
        logits = jnp.dot(h_new.astype(jnp.bfloat16), w_out,
                         preferred_element_type=jnp.float32) + b_out   # [B, 128]
        max_val = jnp.max(logits, axis=-1, keepdims=True)
        cand = jnp.where(logits == max_val, o_iota, out_cols)
        next_tok = jnp.min(cand, axis=-1, keepdims=True).astype(jnp.int32)

        # store next_tok into column `step` (compare+select on the hoisted iota)
        toks = jnp.where(o_iota == step, next_tok, toks)
        return h_new, c_new, next_tok, toks

    # static trip count of 10 — fully unroll for the LLO scheduler
    _, _, _, toks = lax.fori_loop(0, max_len, step_fn,
                                  (h0, c0, tok0, buf0), unroll=True)
    tok_ref[...] = toks          # single unmasked lane-dense [8,128] store


def _fuse_params(params, max_length, k_pad, out_pad, batch_p):
    """Algebraic fusion of the linear path (traced under the outer jit)."""
    vocab, d_model = params["emb"].shape
    w_ih_t = params["w_ih"].T                        # [D, 4D]
    w_hh_t = params["w_hh"].T                        # [D, 4D]
    bias = (params["b_ih"] + params["b_hh"])[None, :]
    emb_proj = params["emb"] @ w_ih_t                # [V, 4D]
    posb_proj = params["pos"][:max_length] @ w_ih_t + bias   # [L, 4D]

    def perm_gates(m):
        # PyTorch gate order i,f,g,o  ->  i,f,o,g (sigmoid gates contiguous)
        return jnp.concatenate(
            [m[:, :d_model], m[:, d_model:2 * d_model],
             m[:, 3 * d_model:], m[:, 2 * d_model:3 * d_model]], axis=1)

    pad_rows = k_pad - vocab - d_model - max_length
    w_fused = jnp.concatenate(
        [perm_gates(emb_proj), perm_gates(w_hh_t), perm_gates(posb_proj),
         jnp.zeros((pad_rows, 4 * d_model), jnp.float32)],
        axis=0).astype(jnp.bfloat16)                  # [k_pad, 4D]

    # output projection padded to 128 lanes; padded bias lanes = -1e30 so they
    # can never win the argmax.
    w_out_pad = jnp.pad(params["w_out"].T,
                        ((0, 0), (0, out_pad - vocab))).astype(jnp.bfloat16)
    b_out_pad = jnp.pad(params["b_out"], (0, out_pad - vocab),
                        constant_values=-1e30)[None, :].astype(jnp.float32)
    b_out_b = jnp.broadcast_to(b_out_pad, (batch_p, out_pad))
    return w_fused, w_out_pad, b_out_b


@functools.partial(jax.jit, static_argnames=("max_length",))
def use_term_generator_forward(context, params, max_length=10):
    """Pallas forward for UseTermGenerator (inference / generation branch)."""
    batch, d_model = context.shape
    vocab = params["emb"].shape[0]
    assert max_length <= OUT_LANES and vocab <= OUT_LANES
    batch_p = max(SUBLANES, ((batch + SUBLANES - 1) // SUBLANES) * SUBLANES)
    k_raw = vocab + d_model + max_length
    k_pad = ((k_raw + 127) // 128) * 128              # lane-dense fused K

    ctx_p = jnp.pad(context.astype(jnp.float32),
                    ((0, batch_p - batch), (0, 0)))
    w_fused, w_out_pad, b_out_b = _fuse_params(params, max_length, k_pad,
                                               OUT_LANES, batch_p)

    vmem = pl.BlockSpec(memory_space=pltpu.MemorySpace.VMEM)
    kernel = functools.partial(_use_term_kernel, vocab=vocab, max_len=max_length)
    # Working set < 100 KiB: gridless, everything resident in VMEM.
    # TODO(synk): for batch in the hundreds, add a batch grid axis with
    # dimension_semantics=("parallel",) to shard across v7x's 2 TensorCores.
    tokens = pl.pallas_call(
        kernel,
        out_shape=jax.ShapeDtypeStruct((batch_p, OUT_LANES), jnp.int32),
        in_specs=[vmem] * 4,
        out_specs=vmem,
    )(ctx_p, w_fused, w_out_pad, b_out_b)
    return tokens[:batch, :max_length]


def make_params(key, d_model, vocab_size):
    """PyTorch-layout parameters (gate order i,f,g,o, weights [out,in])."""
    ks = jax.random.split(key, 8)
    s = 1.0 / np.sqrt(d_model)
    emb = jax.random.normal(ks[0], (vocab_size, d_model), jnp.float32)
    pos = jax.random.normal(ks[1], (100, d_model), jnp.float32)
    w_ih = jax.random.uniform(ks[2], (4 * d_model, d_model), jnp.float32, -s, s)
    w_hh = jax.random.uniform(ks[3], (4 * d_model, d_model), jnp.float32, -s, s)
    b_ih = jax.random.uniform(ks[4], (4 * d_model,), jnp.float32, -s, s)
    b_hh = jax.random.uniform(ks[5], (4 * d_model,), jnp.float32, -s, s)
    w_out = jax.random.uniform(ks[6], (vocab_size, d_model), jnp.float32, -s, s)
    b_out = jax.random.uniform(ks[7], (vocab_size,), jnp.float32, -s, s)
    return {"emb": emb, "pos": pos, "w_ih": w_ih, "w_hh": w_hh,
            "b_ih": b_ih, "b_hh": b_hh, "w_out": w_out, "b_out": b_out}


if __name__ == "__main__":
    d_model = 32
    vocab_size = 32
    batch = 2
    max_length = 10   # UseTermGenerator hard-codes max_length=10

    key = jax.random.PRNGKey(0)
    pkey, ckey = jax.random.split(key)
    params = make_params(pkey, d_model, vocab_size)
    context = jax.random.normal(ckey, (batch, d_model), jnp.float32)

    tokens = use_term_generator_forward(context, params, max_length=max_length)
    tokens = jax.block_until_ready(tokens)

    # Glue: reproduce the PyTorch early-break semantics (loop breaks after the
    # first step where every sampled token == 0; that step is still included).
    toks_np = np.asarray(tokens)
    stop = max_length
    for t in range(max_length):
        if (toks_np[:, t] == 0).all():
            stop = t + 1
            break
    generated_tokens = toks_np[:, :stop]   # == {'generated_tokens': ...}

    assert generated_tokens.shape[0] == batch
    assert 1 <= generated_tokens.shape[1] <= max_length
    assert generated_tokens.dtype == np.int32
    print("KERNEL_OK")
</pallas_src>

<mosaic_0001>
module attributes {stable_mosaic.version = 11 : i64} {
  func.func @_use_term_kernel(%arg0: memref<8x32xf32, #tpu.memory_space<vmem>>, %arg1: memref<128x128xbf16, #tpu.memory_space<vmem>>, %arg2: memref<32x128xbf16, #tpu.memory_space<vmem>>, %arg3: memref<8x128xf32, #tpu.memory_space<vmem>>, %arg4: memref<8x128xi32, #tpu.memory_space<vmem>>) attributes {dimension_semantics = [], scalar_prefetch = 0 : i64, scratch_operands = 0 : i64, tpu.core_type = #tpu.core_type<tc>} {
    %c0 = arith.constant 0 : index
    %c0_0 = arith.constant 0 : index
    %0 = vector.load %arg1[%c0, %c0_0] : memref<128x128xbf16, #tpu.memory_space<vmem>>, vector<128x128xbf16>
    %c0_1 = arith.constant 0 : index
    %c0_2 = arith.constant 0 : index
    %1 = vector.load %arg2[%c0_1, %c0_2] : memref<32x128xbf16, #tpu.memory_space<vmem>>, vector<32x128xbf16>
    %c0_3 = arith.constant 0 : index
    %c0_4 = arith.constant 0 : index
    %2 = vector.load %arg3[%c0_3, %c0_4] : memref<8x128xf32, #tpu.memory_space<vmem>>, vector<8x128xf32>
    %3 = tpu.iota {dimensions = array<i32: 1>} : vector<8x32xi32>
    %4 = tpu.iota {dimensions = array<i32: 1>} : vector<8x64xi32>
    %5 = tpu.iota {dimensions = array<i32: 1>} : vector<8x128xi32>
    %c0_5 = arith.constant 0 : index
    %c0_6 = arith.constant 0 : index
    %6 = vector.load %arg0[%c0_5, %c0_6] : memref<8x32xf32, #tpu.memory_space<vmem>>, vector<8x32xf32>
    %cst = arith.constant 0.000000e+00 : f32
    %7 = vector.broadcast %cst : f32 to vector<8x32xf32>
    %c0_i32 = arith.constant 0 : i32
    %8 = vector.broadcast %c0_i32 : i32 to vector<8x1xi32>
    %c0_i32_7 = arith.constant 0 : i32
    %9 = vector.broadcast %c0_i32_7 : i32 to vector<8x128xi32>
    %c0_i32_8 = arith.constant 0 : i32
    %10 = vector.broadcast %8 : vector<8x1xi32> to vector<8x32xi32>
    %11 = arith.cmpi eq, %3, %10 : vector<8x32xi32>
    %12 = arith.extui %11 : vector<8x32xi1> to vector<8x32xi32>
    %13 = arith.sitofp %12 : vector<8x32xi32> to vector<8x32xf32>
    %14 = vector.broadcast %c0_i32_8 : i32 to vector<8x64xi32>
    %15 = arith.cmpi eq, %4, %14 : vector<8x64xi32>
    %16 = arith.extui %15 : vector<8x64xi1> to vector<8x64xi32>
    %17 = arith.sitofp %16 : vector<8x64xi32> to vector<8x64xf32>
    %18 = tpu.concatenate %13, %6, %17 in 1 : vector<8x32xf32>, vector<8x32xf32>, vector<8x64xf32> -> vector<8x128xf32>
    %19 = arith.truncf %18 : vector<8x128xf32> to vector<8x128xbf16>
    %cst_9 = arith.constant dense<0.000000e+00> : vector<8x128xf32>
    %20 = tpu.matmul %19, %0, %cst_9 {dimension_numbers = #tpu.dot_dimension_numbers<[1], [0], [0], [1], [0, 0, 1, 1], [], []>} : vector<8x128xbf16>, vector<128x128xbf16>, vector<8x128xf32> -> vector<8x128xf32>
    %21 = vector.extract_strided_slice %20 {offsets = [0, 0], sizes = [8, 96], strides = [1, 1]} : vector<8x128xf32> to vector<8x96xf32>
    %22 = arith.negf %21 : vector<8x96xf32>
    %23 = math.exp %22 : vector<8x96xf32>
    %cst_10 = arith.constant 1.000000e+00 : f32
    %24 = vector.broadcast %cst_10 : f32 to vector<8x96xf32>
    %25 = arith.addf %24, %23 : vector<8x96xf32>
    %26 = arith.divf %24, %25 : vector<8x96xf32>
    %27 = vector.extract_strided_slice %20 {offsets = [0, 96], sizes = [8, 32], strides = [1, 1]} : vector<8x128xf32> to vector<8x32xf32>
    %28 = math.tanh %27 : vector<8x32xf32>
    %29 = vector.extract_strided_slice %26 {offsets = [0, 0], sizes = [8, 32], strides = [1, 1]} : vector<8x96xf32> to vector<8x32xf32>
    %30 = vector.extract_strided_slice %26 {offsets = [0, 32], sizes = [8, 32], strides = [1, 1]} : vector<8x96xf32> to vector<8x32xf32>
    %31 = vector.extract_strided_slice %26 {offsets = [0, 64], sizes = [8, 32], strides = [1, 1]} : vector<8x96xf32> to vector<8x32xf32>
    %32 = arith.mulf %30, %7 : vector<8x32xf32>
    %33 = arith.mulf %29, %28 : vector<8x32xf32>
    %34 = arith.addf %32, %33 : vector<8x32xf32>
    %35 = math.tanh %34 : vector<8x32xf32>
    %36 = arith.mulf %31, %35 : vector<8x32xf32>
    %37 = arith.truncf %36 : vector<8x32xf32> to vector<8x32xbf16>
    %cst_11 = arith.constant dense<0.000000e+00> : vector<8x128xf32>
    %38 = tpu.matmul %37, %1, %cst_11 {dimension_numbers = #tpu.dot_dimension_numbers<[1], [0], [0], [1], [0, 0, 1, 1], [], []>} : vector<8x32xbf16>, vector<32x128xbf16>, vector<8x128xf32> -> vector<8x128xf32>
    %39 = arith.addf %38, %2 : vector<8x128xf32>
    %cst_12 = arith.constant dense<0xFF800000> : vector<8xf32>
    %40 = vector.multi_reduction <maximumf>, %39, %cst_12 [1] : vector<8x128xf32> to vector<8xf32>
    %41 = vector.shape_cast %40 : vector<8xf32> to vector<8x1xf32>
    %42 = vector.broadcast %41 : vector<8x1xf32> to vector<8x128xf32>
    %43 = arith.cmpf oeq, %39, %42 : vector<8x128xf32>
    %c128_i32 = arith.constant 128 : i32
    %44 = vector.broadcast %c128_i32 : i32 to vector<8x128xi32>
    %45 = arith.select %43, %5, %44 : vector<8x128xi1>, vector<8x128xi32>
    %cst_13 = arith.constant dense<2147483647> : vector<8xi32>
    %46 = vector.multi_reduction <minsi>, %45, %cst_13 [1] : vector<8x128xi32> to vector<8xi32>
    %47 = vector.shape_cast %46 : vector<8xi32> to vector<8x1xi32>
    %48 = vector.broadcast %c0_i32_8 : i32 to vector<8x128xi32>
    %49 = arith.cmpi eq, %5, %48 : vector<8x128xi32>
    %50 = vector.shape_cast %47 : vector<8x1xi32> to vector<8x1xi32>
    %51 = vector.broadcast %50 : vector<8x1xi32> to vector<8x128xi32>
    %52 = arith.select %49, %51, %9 : vector<8x128xi1>, vector<8x128xi32>
    %c1_i32 = arith.constant 1 : i32
    %53 = vector.broadcast %47 : vector<8x1xi32> to vector<8x32xi32>
    %54 = arith.cmpi eq, %3, %53 : vector<8x32xi32>
    %55 = arith.extui %54 : vector<8x32xi1> to vector<8x32xi32>
    %56 = arith.sitofp %55 : vector<8x32xi32> to vector<8x32xf32>
    %57 = vector.broadcast %c1_i32 : i32 to vector<8x64xi32>
    %58 = arith.cmpi eq, %4, %57 : vector<8x64xi32>
    %59 = arith.extui %58 : vector<8x64xi1> to vector<8x64xi32>
    %60 = arith.sitofp %59 : vector<8x64xi32> to vector<8x64xf32>
    %61 = tpu.concatenate %56, %36, %60 in 1 : vector<8x32xf32>, vector<8x32xf32>, vector<8x64xf32> -> vector<8x128xf32>
    %62 = arith.truncf %61 : vector<8x128xf32> to vector<8x128xbf16>
    %cst_14 = arith.constant dense<0.000000e+00> : vector<8x128xf32>
    %63 = tpu.matmul %62, %0, %cst_14 {dimension_numbers = #tpu.dot_dimension_numbers<[1], [0], [0], [1], [0, 0, 1, 1], [], []>} : vector<8x128xbf16>, vector<128x128xbf16>, vector<8x128xf32> -> vector<8x128xf32>
    %64 = vector.extract_strided_slice %63 {offsets = [0, 0], sizes = [8, 96], strides = [1, 1]} : vector<8x128xf32> to vector<8x96xf32>
    %65 = arith.negf %64 : vector<8x96xf32>
    %66 = math.exp %65 : vector<8x96xf32>
    %cst_15 = arith.constant 1.000000e+00 : f32
    %67 = vector.broadcast %cst_15 : f32 to vector<8x96xf32>
    %68 = arith.addf %67, %66 : vector<8x96xf32>
    %69 = arith.divf %67, %68 : vector<8x96xf32>
    %70 = vector.extract_strided_slice %63 {offsets = [0, 96], sizes = [8, 32], strides = [1, 1]} : vector<8x128xf32> to vector<8x32xf32>
    %71 = math.tanh %70 : vector<8x32xf32>
    %72 = vector.extract_strided_slice %69 {offsets = [0, 0], sizes = [8, 32], strides = [1, 1]} : vector<8x96xf32> to vector<8x32xf32>
    %73 = vector.extract_strided_slice %69 {offsets = [0, 32], sizes = [8, 32], strides = [1, 1]} : vector<8x96xf32> to vector<8x32xf32>
    %74 = vector.extract_strided_slice %69 {offsets = [0, 64], sizes = [8, 32], strides = [1, 1]} : vector<8x96xf32> to vector<8x32xf32>
    %75 = arith.mulf %73, %34 : vector<8x32xf32>
    %76 = arith.mulf %72, %71 : vector<8x32xf32>
    %77 = arith.addf %75, %76 : vector<8x32xf32>
    %78 = math.tanh %77 : vector<8x32xf32>
    %79 = arith.mulf %74, %78 : vector<8x32xf32>
    %80 = arith.truncf %79 : vector<8x32xf32> to vector<8x32xbf16>
    %cst_16 = arith.constant dense<0.000000e+00> : vector<8x128xf32>
    %81 = tpu.matmul %80, %1, %cst_16 {dimension_numbers = #tpu.dot_dimension_numbers<[1], [0], [0], [1], [0, 0, 1, 1], [], []>} : vector<8x32xbf16>, vector<32x128xbf16>, vector<8x128xf32> -> vector<8x128xf32>
    %82 = arith.addf %81, %2 : vector<8x128xf32>
    %cst_17 = arith.constant dense<0xFF800000> : vector<8xf32>
    %83 = vector.multi_reduction <maximumf>, %82, %cst_17 [1] : vector<8x128xf32> to vector<8xf32>
    %84 = vector.shape_cast %83 : vector<8xf32> to vector<8x1xf32>
    %85 = vector.broadcast %84 : vector<8x1xf32> to vector<8x128xf32>
    %86 = arith.cmpf oeq, %82, %85 : vector<8x128xf32>
    %c128_i32_18 = arith.constant 128 : i32
    %87 = vector.broadcast %c128_i32_18 : i32 to vector<8x128xi32>
    %88 = arith.select %86, %5, %87 : vector<8x128xi1>, vector<8x128xi32>
    %cst_19 = arith.constant dense<2147483647> : vector<8xi32>
    %89 = vector.multi_reduction <minsi>, %88, %cst_19 [1] : vector<8x128xi32> to vector<8xi32>
    %90 = vector.shape_cast %89 : vector<8xi32> to vector<8x1xi32>
    %91 = vector.broadcast %c1_i32 : i32 to vector<8x128xi32>
    %92 = arith.cmpi eq, %5, %91 : vector<8x128xi32>
    %93 = vector.shape_cast %90 : vector<8x1xi32> to vector<8x1xi32>
    %94 = vector.broadcast %93 : vector<8x1xi32> to vector<8x128xi32>
    %95 = arith.select %92, %94, %52 : vector<8x128xi1>, vector<8x128xi32>
    %c2_i32 = arith.constant 2 : i32
    %96 = vector.broadcast %90 : vector<8x1xi32> to vector<8x32xi32>
    %97 = arith.cmpi eq, %3, %96 : vector<8x32xi32>
    %98 = arith.extui %97 : vector<8x32xi1> to vector<8x32xi32>
    %99 = arith.sitofp %98 : vector<8x32xi32> to vector<8x32xf32>
    %100 = vector.broadcast %c2_i32 : i32 to vector<8x64xi32>
    %101 = arith.cmpi eq, %4, %100 : vector<8x64xi32>
    %102 = arith.extui %101 : vector<8x64xi1> to vector<8x64xi32>
    %103 = arith.sitofp %102 : vector<8x64xi32> to vector<8x64xf32>
    %104 = tpu.concatenate %99, %79, %103 in 1 : vector<8x32xf32>, vector<8x32xf32>, vector<8x64xf32> -> vector<8x128xf32>
    %105 = arith.truncf %104 : vector<8x128xf32> to vector<8x128xbf16>
    %cst_20 = arith.constant dense<0.000000e+00> : vector<8x128xf32>
    %106 = tpu.matmul %105, %0, %cst_20 {dimension_numbers = #tpu.dot_dimension_numbers<[1], [0], [0], [1], [0, 0, 1, 1], [], []>} : vector<8x128xbf16>, vector<128x128xbf16>, vector<8x128xf32> -> vector<8x128xf32>
    %107 = vector.extract_strided_slice %106 {offsets = [0, 0], sizes = [8, 96], strides = [1, 1]} : vector<8x128xf32> to vector<8x96xf32>
    %108 = arith.negf %107 : vector<8x96xf32>
    %109 = math.exp %108 : vector<8x96xf32>
    %cst_21 = arith.constant 1.000000e+00 : f32
    %110 = vector.broadcast %cst_21 : f32 to vector<8x96xf32>
    %111 = arith.addf %110, %109 : vector<8x96xf32>
    %112 = arith.divf %110, %111 : vector<8x96xf32>
    %113 = vector.extract_strided_slice %106 {offsets = [0, 96], sizes = [8, 32], strides = [1, 1]} : vector<8x128xf32> to vector<8x32xf32>
    %114 = math.tanh %113 : vector<8x32xf32>
    %115 = vector.extract_strided_slice %112 {offsets = [0, 0], sizes = [8, 32], strides = [1, 1]} : vector<8x96xf32> to vector<8x32xf32>
    %116 = vector.extract_strided_slice %112 {offsets = [0, 32], sizes = [8, 32], strides = [1, 1]} : vector<8x96xf32> to vector<8x32xf32>
    %117 = vector.extract_strided_slice %112 {offsets = [0, 64], sizes = [8, 32], strides = [1, 1]} : vector<8x96xf32> to vector<8x32xf32>
    %118 = arith.mulf %116, %77 : vector<8x32xf32>
    %119 = arith.mulf %115, %114 : vector<8x32xf32>
    %120 = arith.addf %118, %119 : vector<8x32xf32>
    %121 = math.tanh %120 : vector<8x32xf32>
    %122 = arith.mulf %117, %121 : vector<8x32xf32>
    %123 = arith.truncf %122 : vector<8x32xf32> to vector<8x32xbf16>
    %cst_22 = arith.constant dense<0.000000e+00> : vector<8x128xf32>
    %124 = tpu.matmul %123, %1, %cst_22 {dimension_numbers = #tpu.dot_dimension_numbers<[1], [0], [0], [1], [0, 0, 1, 1], [], []>} : vector<8x32xbf16>, vector<32x128xbf16>, vector<8x128xf32> -> vector<8x128xf32>
    %125 = arith.addf %124, %2 : vector<8x128xf32>
    %cst_23 = arith.constant dense<0xFF800000> : vector<8xf32>
    %126 = vector.multi_reduction <maximumf>, %125, %cst_23 [1] : vector<8x128xf32> to vector<8xf32>
    %127 = vector.shape_cast %126 : vector<8xf32> to vector<8x1xf32>
    %128 = vector.broadcast %127 : vector<8x1xf32> to vector<8x128xf32>
    %129 = arith.cmpf oeq, %125, %128 : vector<8x128xf32>
    %c128_i32_24 = arith.constant 128 : i32
    %130 = vector.broadcast %c128_i32_24 : i32 to vector<8x128xi32>
    %131 = arith.select %129, %5, %130 : vector<8x128xi1>, vector<8x128xi32>
    %cst_25 = arith.constant dense<2147483647> : vector<8xi32>
    %132 = vector.multi_reduction <minsi>, %131, %cst_25 [1] : vector<8x128xi32> to vector<8xi32>
    %133 = vector.shape_cast %132 : vector<8xi32> to vector<8x1xi32>
    %134 = vector.broadcast %c2_i32 : i32 to vector<8x128xi32>
    %135 = arith.cmpi eq, %5, %134 : vector<8x128xi32>
    %136 = vector.shape_cast %133 : vector<8x1xi32> to vector<8x1xi32>
    %137 = vector.broadcast %136 : vector<8x1xi32> to vector<8x128xi32>
    %138 = arith.select %135, %137, %95 : vector<8x128xi1>, vector<8x128xi32>
    %c3_i32 = arith.constant 3 : i32
    %139 = vector.broadcast %133 : vector<8x1xi32> to vector<8x32xi32>
    %140 = arith.cmpi eq, %3, %139 : vector<8x32xi32>
    %141 = arith.extui %140 : vector<8x32xi1> to vector<8x32xi32>
    %142 = arith.sitofp %141 : vector<8x32xi32> to vector<8x32xf32>
    %143 = vector.broadcast %c3_i32 : i32 to vector<8x64xi32>
    %144 = arith.cmpi eq, %4, %143 : vector<8x64xi32>
    %145 = arith.extui %144 : vector<8x64xi1> to vector<8x64xi32>
    %146 = arith.sitofp %145 : vector<8x64xi32> to vector<8x64xf32>
    %147 = tpu.concatenate %142, %122, %146 in 1 : vector<8x32xf32>, vector<8x32xf32>, vector<8x64xf32> -> vector<8x128xf32>
    %148 = arith.truncf %147 : vector<8x128xf32> to vector<8x128xbf16>
    %cst_26 = arith.constant dense<0.000000e+00> : vector<8x128xf32>
    %149 = tpu.matmul %148, %0, %cst_26 {dimension_numbers = #tpu.dot_dimension_numbers<[1], [0], [0], [1], [0, 0, 1, 1], [], []>} : vector<8x128xbf16>, vector<128x128xbf16>, vector<8x128xf32> -> vector<8x128xf32>
    %150 = vector.extract_strided_slice %149 {offsets = [0, 0], sizes = [8, 96], strides = [1, 1]} : vector<8x128xf32> to vector<8x96xf32>
    %151 = arith.negf %150 : vector<8x96xf32>
    %152 = math.exp %151 : vector<8x96xf32>
    %cst_27 = arith.constant 1.000000e+00 : f32
    %153 = vector.broadcast %cst_27 : f32 to vector<8x96xf32>
    %154 = arith.addf %153, %152 : vector<8x96xf32>
    %155 = arith.divf %153, %154 : vector<8x96xf32>
    %156 = vector.extract_strided_slice %149 {offsets = [0, 96], sizes = [8, 32], strides = [1, 1]} : vector<8x128xf32> to vector<8x32xf32>
    %157 = math.tanh %156 : vector<8x32xf32>
    %158 = vector.extract_strided_slice %155 {offsets = [0, 0], sizes = [8, 32], strides = [1, 1]} : vector<8x96xf32> to vector<8x32xf32>
    %159 = vector.extract_strided_slice %155 {offsets = [0, 32], sizes = [8, 32], strides = [1, 1]} : vector<8x96xf32> to vector<8x32xf32>
    %160 = vector.extract_strided_slice %155 {offsets = [0, 64], sizes = [8, 32], strides = [1, 1]} : vector<8x96xf32> to vector<8x32xf32>
    %161 = arith.mulf %159, %120 : vector<8x32xf32>
    %162 = arith.mulf %158, %157 : vector<8x32xf32>
    %163 = arith.addf %161, %162 : vector<8x32xf32>
    %164 = math.tanh %163 : vector<8x32xf32>
    %165 = arith.mulf %160, %164 : vector<8x32xf32>
    %166 = arith.truncf %165 : vector<8x32xf32> to vector<8x32xbf16>
    %cst_28 = arith.constant dense<0.000000e+00> : vector<8x128xf32>
    %167 = tpu.matmul %166, %1, %cst_28 {dimension_numbers = #tpu.dot_dimension_numbers<[1], [0], [0], [1], [0, 0, 1, 1], [], []>} : vector<8x32xbf16>, vector<32x128xbf16>, vector<8x128xf32> -> vector<8x128xf32>
    %168 = arith.addf %167, %2 : vector<8x128xf32>
    %cst_29 = arith.constant dense<0xFF800000> : vector<8xf32>
    %169 = vector.multi_reduction <maximumf>, %168, %cst_29 [1] : vector<8x128xf32> to vector<8xf32>
    %170 = vector.shape_cast %169 : vector<8xf32> to vector<8x1xf32>
    %171 = vector.broadcast %170 : vector<8x1xf32> to vector<8x128xf32>
    %172 = arith.cmpf oeq, %168, %171 : vector<8x128xf32>
    %c128_i32_30 = arith.constant 128 : i32
    %173 = vector.broadcast %c128_i32_30 : i32 to vector<8x128xi32>
    %174 = arith.select %172, %5, %173 : vector<8x128xi1>, vector<8x128xi32>
    %cst_31 = arith.constant dense<2147483647> : vector<8xi32>
    %175 = vector.multi_reduction <minsi>, %174, %cst_31 [1] : vector<8x128xi32> to vector<8xi32>
    %176 = vector.shape_cast %175 : vector<8xi32> to vector<8x1xi32>
    %177 = vector.broadcast %c3_i32 : i32 to vector<8x128xi32>
    %178 = arith.cmpi eq, %5, %177 : vector<8x128xi32>
    %179 = vector.shape_cast %176 : vector<8x1xi32> to vector<8x1xi32>
    %180 = vector.broadcast %179 : vector<8x1xi32> to vector<8x128xi32>
    %181 = arith.select %178, %180, %138 : vector<8x128xi1>, vector<8x128xi32>
    %c4_i32 = arith.constant 4 : i32
    %182 = vector.broadcast %176 : vector<8x1xi32> to vector<8x32xi32>
    %183 = arith.cmpi eq, %3, %182 : vector<8x32xi32>
    %184 = arith.extui %183 : vector<8x32xi1> to vector<8x32xi32>
    %185 = arith.sitofp %184 : vector<8x32xi32> to vector<8x32xf32>
    %186 = vector.broadcast %c4_i32 : i32 to vector<8x64xi32>
    %187 = arith.cmpi eq, %4, %186 : vector<8x64xi32>
    %188 = arith.extui %187 : vector<8x64xi1> to vector<8x64xi32>
    %189 = arith.sitofp %188 : vector<8x64xi32> to vector<8x64xf32>
    %190 = tpu.concatenate %185, %165, %189 in 1 : vector<8x32xf32>, vector<8x32xf32>, vector<8x64xf32> -> vector<8x128xf32>
    %191 = arith.truncf %190 : vector<8x128xf32> to vector<8x128xbf16>
    %cst_32 = arith.constant dense<0.000000e+00> : vector<8x128xf32>
    %192 = tpu.matmul %191, %0, %cst_32 {dimension_numbers = #tpu.dot_dimension_numbers<[1], [0], [0], [1], [0, 0, 1, 1], [], []>} : vector<8x128xbf16>, vector<128x128xbf16>, vector<8x128xf32> -> vector<8x128xf32>
    %193 = vector.extract_strided_slice %192 {offsets = [0, 0], sizes = [8, 96], strides = [1, 1]} : vector<8x128xf32> to vector<8x96xf32>
    %194 = arith.negf %193 : vector<8x96xf32>
    %195 = math.exp %194 : vector<8x96xf32>
    %cst_33 = arith.constant 1.000000e+00 : f32
    %196 = vector.broadcast %cst_33 : f32 to vector<8x96xf32>
    %197 = arith.addf %196, %195 : vector<8x96xf32>
    %198 = arith.divf %196, %197 : vector<8x96xf32>
    %199 = vector.extract_strided_slice %192 {offsets = [0, 96], sizes = [8, 32], strides = [1, 1]} : vector<8x128xf32> to vector<8x32xf32>
    %200 = math.tanh %199 : vector<8x32xf32>
    %201 = vector.extract_strided_slice %198 {offsets = [0, 0], sizes = [8, 32], strides = [1, 1]} : vector<8x96xf32> to vector<8x32xf32>
    %202 = vector.extract_strided_slice %198 {offsets = [0, 32], sizes = [8, 32], strides = [1, 1]} : vector<8x96xf32> to vector<8x32xf32>
    %203 = vector.extract_strided_slice %198 {offsets = [0, 64], sizes = [8, 32], strides = [1, 1]} : vector<8x96xf32> to vector<8x32xf32>
    %204 = arith.mulf %202, %163 : vector<8x32xf32>
    %205 = arith.mulf %201, %200 : vector<8x32xf32>
    %206 = arith.addf %204, %205 : vector<8x32xf32>
    %207 = math.tanh %206 : vector<8x32xf32>
    %208 = arith.mulf %203, %207 : vector<8x32xf32>
    %209 = arith.truncf %208 : vector<8x32xf32> to vector<8x32xbf16>
    %cst_34 = arith.constant dense<0.000000e+00> : vector<8x128xf32>
    %210 = tpu.matmul %209, %1, %cst_34 {dimension_numbers = #tpu.dot_dimension_numbers<[1], [0], [0], [1], [0, 0, 1, 1], [], []>} : vector<8x32xbf16>, vector<32x128xbf16>, vector<8x128xf32> -> vector<8x128xf32>
    %211 = arith.addf %210, %2 : vector<8x128xf32>
    %cst_35 = arith.constant dense<0xFF800000> : vector<8xf32>
    %212 = vector.multi_reduction <maximumf>, %211, %cst_35 [1] : vector<8x128xf32> to vector<8xf32>
    %213 = vector.shape_cast %212 : vector<8xf32> to vector<8x1xf32>
    %214 = vector.broadcast %213 : vector<8x1xf32> to vector<8x128xf32>
    %215 = arith.cmpf oeq, %211, %214 : vector<8x128xf32>
    %c128_i32_36 = arith.constant 128 : i32
    %216 = vector.broadcast %c128_i32_36 : i32 to vector<8x128xi32>
    %217 = arith.select %215, %5, %216 : vector<8x128xi1>, vector<8x128xi32>
    %cst_37 = arith.constant dense<2147483647> : vector<8xi32>
    %218 = vector.multi_reduction <minsi>, %217, %cst_37 [1] : vector<8x128xi32> to vector<8xi32>
    %219 = vector.shape_cast %218 : vector<8xi32> to vector<8x1xi32>
    %220 = vector.broadcast %c4_i32 : i32 to vector<8x128xi32>
    %221 = arith.cmpi eq, %5, %220 : vector<8x128xi32>
    %222 = vector.shape_cast %219 : vector<8x1xi32> to vector<8x1xi32>
    %223 = vector.broadcast %222 : vector<8x1xi32> to vector<8x128xi32>
    %224 = arith.select %221, %223, %181 : vector<8x128xi1>, vector<8x128xi32>
    %c5_i32 = arith.constant 5 : i32
    %225 = vector.broadcast %219 : vector<8x1xi32> to vector<8x32xi32>
    %226 = arith.cmpi eq, %3, %225 : vector<8x32xi32>
    %227 = arith.extui %226 : vector<8x32xi1> to vector<8x32xi32>
    %228 = arith.sitofp %227 : vector<8x32xi32> to vector<8x32xf32>
    %229 = vector.broadcast %c5_i32 : i32 to vector<8x64xi32>
    %230 = arith.cmpi eq, %4, %229 : vector<8x64xi32>
    %231 = arith.extui %230 : vector<8x64xi1> to vector<8x64xi32>
    %232 = arith.sitofp %231 : vector<8x64xi32> to vector<8x64xf32>
    %233 = tpu.concatenate %228, %208, %232 in 1 : vector<8x32xf32>, vector<8x32xf32>, vector<8x64xf32> -> vector<8x128xf32>
    %234 = arith.truncf %233 : vector<8x128xf32> to vector<8x128xbf16>
    %cst_38 = arith.constant dense<0.000000e+00> : vector<8x128xf32>
    %235 = tpu.matmul %234, %0, %cst_38 {dimension_numbers = #tpu.dot_dimension_numbers<[1], [0], [0], [1], [0, 0, 1, 1], [], []>} : vector<8x128xbf16>, vector<128x128xbf16>, vector<8x128xf32> -> vector<8x128xf32>
    %236 = vector.extract_strided_slice %235 {offsets = [0, 0], sizes = [8, 96], strides = [1, 1]} : vector<8x128xf32> to vector<8x96xf32>
    %237 = arith.negf %236 : vector<8x96xf32>
    %238 = math.exp %237 : vector<8x96xf32>
    %cst_39 = arith.constant 1.000000e+00 : f32
    %239 = vector.broadcast %cst_39 : f32 to vector<8x96xf32>
    %240 = arith.addf %239, %238 : vector<8x96xf32>
    %241 = arith.divf %239, %240 : vector<8x96xf32>
    %242 = vector.extract_strided_slice %235 {offsets = [0, 96], sizes = [8, 32], strides = [1, 1]} : vector<8x128xf32> to vector<8x32xf32>
    %243 = math.tanh %242 : vector<8x32xf32>
    %244 = vector.extract_strided_slice %241 {offsets = [0, 0], sizes = [8, 32], strides = [1, 1]} : vector<8x96xf32> to vector<8x32xf32>
    %245 = vector.extract_strided_slice %241 {offsets = [0, 32], sizes = [8, 32], strides = [1, 1]} : vector<8x96xf32> to vector<8x32xf32>
    %246 = vector.extract_strided_slice %241 {offsets = [0, 64], sizes = [8, 32], strides = [1, 1]} : vector<8x96xf32> to vector<8x32xf32>
    %247 = arith.mulf %245, %206 : vector<8x32xf32>
    %248 = arith.mulf %244, %243 : vector<8x32xf32>
    %249 = arith.addf %247, %248 : vector<8x32xf32>
    %250 = math.tanh %249 : vector<8x32xf32>
    %251 = arith.mulf %246, %250 : vector<8x32xf32>
    %252 = arith.truncf %251 : vector<8x32xf32> to vector<8x32xbf16>
    %cst_40 = arith.constant dense<0.000000e+00> : vector<8x128xf32>
    %253 = tpu.matmul %252, %1, %cst_40 {dimension_numbers = #tpu.dot_dimension_numbers<[1], [0], [0], [1], [0, 0, 1, 1], [], []>} : vector<8x32xbf16>, vector<32x128xbf16>, vector<8x128xf32> -> vector<8x128xf32>
    %254 = arith.addf %253, %2 : vector<8x128xf32>
    %cst_41 = arith.constant dense<0xFF800000> : vector<8xf32>
    %255 = vector.multi_reduction <maximumf>, %254, %cst_41 [1] : vector<8x128xf32> to vector<8xf32>
    %256 = vector.shape_cast %255 : vector<8xf32> to vector<8x1xf32>
    %257 = vector.broadcast %256 : vector<8x1xf32> to vector<8x128xf32>
    %258 = arith.cmpf oeq, %254, %257 : vector<8x128xf32>
    %c128_i32_42 = arith.constant 128 : i32
    %259 = vector.broadcast %c128_i32_42 : i32 to vector<8x128xi32>
    %260 = arith.select %258, %5, %259 : vector<8x128xi1>, vector<8x128xi32>
    %cst_43 = arith.constant dense<2147483647> : vector<8xi32>
    %261 = vector.multi_reduction <minsi>, %260, %cst_43 [1] : vector<8x128xi32> to vector<8xi32>
    %262 = vector.shape_cast %261 : vector<8xi32> to vector<8x1xi32>
    %263 = vector.broadcast %c5_i32 : i32 to vector<8x128xi32>
    %264 = arith.cmpi eq, %5, %263 : vector<8x128xi32>
    %265 = vector.shape_cast %262 : vector<8x1xi32> to vector<8x1xi32>
    %266 = vector.broadcast %265 : vector<8x1xi32> to vector<8x128xi32>
    %267 = arith.select %264, %266, %224 : vector<8x128xi1>, vector<8x128xi32>
    %c6_i32 = arith.constant 6 : i32
    %268 = vector.broadcast %262 : vector<8x1xi32> to vector<8x32xi32>
    %269 = arith.cmpi eq, %3, %268 : vector<8x32xi32>
    %270 = arith.extui %269 : vector<8x32xi1> to vector<8x32xi32>
    %271 = arith.sitofp %270 : vector<8x32xi32> to vector<8x32xf32>
    %272 = vector.broadcast %c6_i32 : i32 to vector<8x64xi32>
    %273 = arith.cmpi eq, %4, %272 : vector<8x64xi32>
    %274 = arith.extui %273 : vector<8x64xi1> to vector<8x64xi32>
    %275 = arith.sitofp %274 : vector<8x64xi32> to vector<8x64xf32>
    %276 = tpu.concatenate %271, %251, %275 in 1 : vector<8x32xf32>, vector<8x32xf32>, vector<8x64xf32> -> vector<8x128xf32>
    %277 = arith.truncf %276 : vector<8x128xf32> to vector<8x128xbf16>
    %cst_44 = arith.constant dense<0.000000e+00> : vector<8x128xf32>
    %278 = tpu.matmul %277, %0, %cst_44 {dimension_numbers = #tpu.dot_dimension_numbers<[1], [0], [0], [1], [0, 0, 1, 1], [], []>} : vector<8x128xbf16>, vector<128x128xbf16>, vector<8x128xf32> -> vector<8x128xf32>
    %279 = vector.extract_strided_slice %278 {offsets = [0, 0], sizes = [8, 96], strides = [1, 1]} : vector<8x128xf32> to vector<8x96xf32>
    %280 = arith.negf %279 : vector<8x96xf32>
    %281 = math.exp %280 : vector<8x96xf32>
    %cst_45 = arith.constant 1.000000e+00 : f32
    %282 = vector.broadcast %cst_45 : f32 to vector<8x96xf32>
    %283 = arith.addf %282, %281 : vector<8x96xf32>
    %284 = arith.divf %282, %283 : vector<8x96xf32>
    %285 = vector.extract_strided_slice %278 {offsets = [0, 96], sizes = [8, 32], strides = [1, 1]} : vector<8x128xf32> to vector<8x32xf32>
    %286 = math.tanh %285 : vector<8x32xf32>
    %287 = vector.extract_strided_slice %284 {offsets = [0, 0], sizes = [8, 32], strides = [1, 1]} : vector<8x96xf32> to vector<8x32xf32>
    %288 = vector.extract_strided_slice %284 {offsets = [0, 32], sizes = [8, 32], strides = [1, 1]} : vector<8x96xf32> to vector<8x32xf32>
    %289 = vector.extract_strided_slice %284 {offsets = [0, 64], sizes = [8, 32], strides = [1, 1]} : vector<8x96xf32> to vector<8x32xf32>
    %290 = arith.mulf %288, %249 : vector<8x32xf32>
    %291 = arith.mulf %287, %286 : vector<8x32xf32>
    %292 = arith.addf %290, %291 : vector<8x32xf32>
    %293 = math.tanh %292 : vector<8x32xf32>
    %294 = arith.mulf %289, %293 : vector<8x32xf32>
    %295 = arith.truncf %294 : vector<8x32xf32> to vector<8x32xbf16>
    %cst_46 = arith.constant dense<0.000000e+00> : vector<8x128xf32>
    %296 = tpu.matmul %295, %1, %cst_46 {dimension_numbers = #tpu.dot_dimension_numbers<[1], [0], [0], [1], [0, 0, 1, 1], [], []>} : vector<8x32xbf16>, vector<32x128xbf16>, vector<8x128xf32> -> vector<8x128xf32>
    %297 = arith.addf %296, %2 : vector<8x128xf32>
    %cst_47 = arith.constant dense<0xFF800000> : vector<8xf32>
    %298 = vector.multi_reduction <maximumf>, %297, %cst_47 [1] : vector<8x128xf32> to vector<8xf32>
    %299 = vector.shape_cast %298 : vector<8xf32> to vector<8x1xf32>
    %300 = vector.broadcast %299 : vector<8x1xf32> to vector<8x128xf32>
    %301 = arith.cmpf oeq, %297, %300 : vector<8x128xf32>
    %c128_i32_48 = arith.constant 128 : i32
    %302 = vector.broadcast %c128_i32_48 : i32 to vector<8x128xi32>
    %303 = arith.select %301, %5, %302 : vector<8x128xi1>, vector<8x128xi32>
    %cst_49 = arith.constant dense<2147483647> : vector<8xi32>
    %304 = vector.multi_reduction <minsi>, %303, %cst_49 [1] : vector<8x128xi32> to vector<8xi32>
    %305 = vector.shape_cast %304 : vector<8xi32> to vector<8x1xi32>
    %306 = vector.broadcast %c6_i32 : i32 to vector<8x128xi32>
    %307 = arith.cmpi eq, %5, %306 : vector<8x128xi32>
    %308 = vector.shape_cast %305 : vector<8x1xi32> to vector<8x1xi32>
    %309 = vector.broadcast %308 : vector<8x1xi32> to vector<8x128xi32>
    %310 = arith.select %307, %309, %267 : vector<8x128xi1>, vector<8x128xi32>
    %c7_i32 = arith.constant 7 : i32
    %311 = vector.broadcast %305 : vector<8x1xi32> to vector<8x32xi32>
    %312 = arith.cmpi eq, %3, %311 : vector<8x32xi32>
    %313 = arith.extui %312 : vector<8x32xi1> to vector<8x32xi32>
    %314 = arith.sitofp %313 : vector<8x32xi32> to vector<8x32xf32>
    %315 = vector.broadcast %c7_i32 : i32 to vector<8x64xi32>
    %316 = arith.cmpi eq, %4, %315 : vector<8x64xi32>
    %317 = arith.extui %316 : vector<8x64xi1> to vector<8x64xi32>
    %318 = arith.sitofp %317 : vector<8x64xi32> to vector<8x64xf32>
    %319 = tpu.concatenate %314, %294, %318 in 1 : vector<8x32xf32>, vector<8x32xf32>, vector<8x64xf32> -> vector<8x128xf32>
    %320 = arith.truncf %319 : vector<8x128xf32> to vector<8x128xbf16>
    %cst_50 = arith.constant dense<0.000000e+00> : vector<8x128xf32>
    %321 = tpu.matmul %320, %0, %cst_50 {dimension_numbers = #tpu.dot_dimension_numbers<[1], [0], [0], [1], [0, 0, 1, 1], [], []>} : vector<8x128xbf16>, vector<128x128xbf16>, vector<8x128xf32> -> vector<8x128xf32>
    %322 = vector.extract_strided_slice %321 {offsets = [0, 0], sizes = [8, 96], strides = [1, 1]} : vector<8x128xf32> to vector<8x96xf32>
    %323 = arith.negf %322 : vector<8x96xf32>
    %324 = math.exp %323 : vector<8x96xf32>
    %cst_51 = arith.constant 1.000000e+00 : f32
    %325 = vector.broadcast %cst_51 : f32 to vector<8x96xf32>
    %326 = arith.addf %325, %324 : vector<8x96xf32>
    %327 = arith.divf %325, %326 : vector<8x96xf32>
    %328 = vector.extract_strided_slice %321 {offsets = [0, 96], sizes = [8, 32], strides = [1, 1]} : vector<8x128xf32> to vector<8x32xf32>
    %329 = math.tanh %328 : vector<8x32xf32>
    %330 = vector.extract_strided_slice %327 {offsets = [0, 0], sizes = [8, 32], strides = [1, 1]} : vector<8x96xf32> to vector<8x32xf32>
    %331 = vector.extract_strided_slice %327 {offsets = [0, 32], sizes = [8, 32], strides = [1, 1]} : vector<8x96xf32> to vector<8x32xf32>
    %332 = vector.extract_strided_slice %327 {offsets = [0, 64], sizes = [8, 32], strides = [1, 1]} : vector<8x96xf32> to vector<8x32xf32>
    %333 = arith.mulf %331, %292 : vector<8x32xf32>
    %334 = arith.mulf %330, %329 : vector<8x32xf32>
    %335 = arith.addf %333, %334 : vector<8x32xf32>
    %336 = math.tanh %335 : vector<8x32xf32>
    %337 = arith.mulf %332, %336 : vector<8x32xf32>
    %338 = arith.truncf %337 : vector<8x32xf32> to vector<8x32xbf16>
    %cst_52 = arith.constant dense<0.000000e+00> : vector<8x128xf32>
    %339 = tpu.matmul %338, %1, %cst_52 {dimension_numbers = #tpu.dot_dimension_numbers<[1], [0], [0], [1], [0, 0, 1, 1], [], []>} : vector<8x32xbf16>, vector<32x128xbf16>, vector<8x128xf32> -> vector<8x128xf32>
    %340 = arith.addf %339, %2 : vector<8x128xf32>
    %cst_53 = arith.constant dense<0xFF800000> : vector<8xf32>
    %341 = vector.multi_reduction <maximumf>, %340, %cst_53 [1] : vector<8x128xf32> to vector<8xf32>
    %342 = vector.shape_cast %341 : vector<8xf32> to vector<8x1xf32>
    %343 = vector.broadcast %342 : vector<8x1xf32> to vector<8x128xf32>
    %344 = arith.cmpf oeq, %340, %343 : vector<8x128xf32>
    %c128_i32_54 = arith.constant 128 : i32
    %345 = vector.broadcast %c128_i32_54 : i32 to vector<8x128xi32>
    %346 = arith.select %344, %5, %345 : vector<8x128xi1>, vector<8x128xi32>
    %cst_55 = arith.constant dense<2147483647> : vector<8xi32>
    %347 = vector.multi_reduction <minsi>, %346, %cst_55 [1] : vector<8x128xi32> to vector<8xi32>
    %348 = vector.shape_cast %347 : vector<8xi32> to vector<8x1xi32>
    %349 = vector.broadcast %c7_i32 : i32 to vector<8x128xi32>
    %350 = arith.cmpi eq, %5, %349 : vector<8x128xi32>
    %351 = vector.shape_cast %348 : vector<8x1xi32> to vector<8x1xi32>
    %352 = vector.broadcast %351 : vector<8x1xi32> to vector<8x128xi32>
    %353 = arith.select %350, %352, %310 : vector<8x128xi1>, vector<8x128xi32>
    %c8_i32 = arith.constant 8 : i32
    %354 = vector.broadcast %348 : vector<8x1xi32> to vector<8x32xi32>
    %355 = arith.cmpi eq, %3, %354 : vector<8x32xi32>
    %356 = arith.extui %355 : vector<8x32xi1> to vector<8x32xi32>
    %357 = arith.sitofp %356 : vector<8x32xi32> to vector<8x32xf32>
    %358 = vector.broadcast %c8_i32 : i32 to vector<8x64xi32>
    %359 = arith.cmpi eq, %4, %358 : vector<8x64xi32>
    %360 = arith.extui %359 : vector<8x64xi1> to vector<8x64xi32>
    %361 = arith.sitofp %360 : vector<8x64xi32> to vector<8x64xf32>
    %362 = tpu.concatenate %357, %337, %361 in 1 : vector<8x32xf32>, vector<8x32xf32>, vector<8x64xf32> -> vector<8x128xf32>
    %363 = arith.truncf %362 : vector<8x128xf32> to vector<8x128xbf16>
    %cst_56 = arith.constant dense<0.000000e+00> : vector<8x128xf32>
    %364 = tpu.matmul %363, %0, %cst_56 {dimension_numbers = #tpu.dot_dimension_numbers<[1], [0], [0], [1], [0, 0, 1, 1], [], []>} : vector<8x128xbf16>, vector<128x128xbf16>, vector<8x128xf32> -> vector<8x128xf32>
    %365 = vector.extract_strided_slice %364 {offsets = [0, 0], sizes = [8, 96], strides = [1, 1]} : vector<8x128xf32> to vector<8x96xf32>
    %366 = arith.negf %365 : vector<8x96xf32>
    %367 = math.exp %366 : vector<8x96xf32>
    %cst_57 = arith.constant 1.000000e+00 : f32
    %368 = vector.broadcast %cst_57 : f32 to vector<8x96xf32>
    %369 = arith.addf %368, %367 : vector<8x96xf32>
    %370 = arith.divf %368, %369 : vector<8x96xf32>
    %371 = vector.extract_strided_slice %364 {offsets = [0, 96], sizes = [8, 32], strides = [1, 1]} : vector<8x128xf32> to vector<8x32xf32>
    %372 = math.tanh %371 : vector<8x32xf32>
    %373 = vector.extract_strided_slice %370 {offsets = [0, 0], sizes = [8, 32], strides = [1, 1]} : vector<8x96xf32> to vector<8x32xf32>
    %374 = vector.extract_strided_slice %370 {offsets = [0, 32], sizes = [8, 32], strides = [1, 1]} : vector<8x96xf32> to vector<8x32xf32>
    %375 = vector.extract_strided_slice %370 {offsets = [0, 64], sizes = [8, 32], strides = [1, 1]} : vector<8x96xf32> to vector<8x32xf32>
    %376 = arith.mulf %374, %335 : vector<8x32xf32>
    %377 = arith.mulf %373, %372 : vector<8x32xf32>
    %378 = arith.addf %376, %377 : vector<8x32xf32>
    %379 = math.tanh %378 : vector<8x32xf32>
    %380 = arith.mulf %375, %379 : vector<8x32xf32>
    %381 = arith.truncf %380 : vector<8x32xf32> to vector<8x32xbf16>
    %cst_58 = arith.constant dense<0.000000e+00> : vector<8x128xf32>
    %382 = tpu.matmul %381, %1, %cst_58 {dimension_numbers = #tpu.dot_dimension_numbers<[1], [0], [0], [1], [0, 0, 1, 1], [], []>} : vector<8x32xbf16>, vector<32x128xbf16>, vector<8x128xf32> -> vector<8x128xf32>
    %383 = arith.addf %382, %2 : vector<8x128xf32>
    %cst_59 = arith.constant dense<0xFF800000> : vector<8xf32>
    %384 = vector.multi_reduction <maximumf>, %383, %cst_59 [1] : vector<8x128xf32> to vector<8xf32>
    %385 = vector.shape_cast %384 : vector<8xf32> to vector<8x1xf32>
    %386 = vector.broadcast %385 : vector<8x1xf32> to vector<8x128xf32>
    %387 = arith.cmpf oeq, %383, %386 : vector<8x128xf32>
    %c128_i32_60 = arith.constant 128 : i32
    %388 = vector.broadcast %c128_i32_60 : i32 to vector<8x128xi32>
    %389 = arith.select %387, %5, %388 : vector<8x128xi1>, vector<8x128xi32>
    %cst_61 = arith.constant dense<2147483647> : vector<8xi32>
    %390 = vector.multi_reduction <minsi>, %389, %cst_61 [1] : vector<8x128xi32> to vector<8xi32>
    %391 = vector.shape_cast %390 : vector<8xi32> to vector<8x1xi32>
    %392 = vector.broadcast %c8_i32 : i32 to vector<8x128xi32>
    %393 = arith.cmpi eq, %5, %392 : vector<8x128xi32>
    %394 = vector.shape_cast %391 : vector<8x1xi32> to vector<8x1xi32>
    %395 = vector.broadcast %394 : vector<8x1xi32> to vector<8x128xi32>
    %396 = arith.select %393, %395, %353 : vector<8x128xi1>, vector<8x128xi32>
    %c9_i32 = arith.constant 9 : i32
    %397 = vector.broadcast %391 : vector<8x1xi32> to vector<8x32xi32>
    %398 = arith.cmpi eq, %3, %397 : vector<8x32xi32>
    %399 = arith.extui %398 : vector<8x32xi1> to vector<8x32xi32>
    %400 = arith.sitofp %399 : vector<8x32xi32> to vector<8x32xf32>
    %401 = vector.broadcast %c9_i32 : i32 to vector<8x64xi32>
    %402 = arith.cmpi eq, %4, %401 : vector<8x64xi32>
    %403 = arith.extui %402 : vector<8x64xi1> to vector<8x64xi32>
    %404 = arith.sitofp %403 : vector<8x64xi32> to vector<8x64xf32>
    %405 = tpu.concatenate %400, %380, %404 in 1 : vector<8x32xf32>, vector<8x32xf32>, vector<8x64xf32> -> vector<8x128xf32>
    %406 = arith.truncf %405 : vector<8x128xf32> to vector<8x128xbf16>
    %cst_62 = arith.constant dense<0.000000e+00> : vector<8x128xf32>
    %407 = tpu.matmul %406, %0, %cst_62 {dimension_numbers = #tpu.dot_dimension_numbers<[1], [0], [0], [1], [0, 0, 1, 1], [], []>} : vector<8x128xbf16>, vector<128x128xbf16>, vector<8x128xf32> -> vector<8x128xf32>
    %408 = vector.extract_strided_slice %407 {offsets = [0, 0], sizes = [8, 96], strides = [1, 1]} : vector<8x128xf32> to vector<8x96xf32>
    %409 = arith.negf %408 : vector<8x96xf32>
    %410 = math.exp %409 : vector<8x96xf32>
    %cst_63 = arith.constant 1.000000e+00 : f32
    %411 = vector.broadcast %cst_63 : f32 to vector<8x96xf32>
    %412 = arith.addf %411, %410 : vector<8x96xf32>
    %413 = arith.divf %411, %412 : vector<8x96xf32>
    %414 = vector.extract_strided_slice %407 {offsets = [0, 96], sizes = [8, 32], strides = [1, 1]} : vector<8x128xf32> to vector<8x32xf32>
    %415 = math.tanh %414 : vector<8x32xf32>
    %416 = vector.extract_strided_slice %413 {offsets = [0, 0], sizes = [8, 32], strides = [1, 1]} : vector<8x96xf32> to vector<8x32xf32>
    %417 = vector.extract_strided_slice %413 {offsets = [0, 32], sizes = [8, 32], strides = [1, 1]} : vector<8x96xf32> to vector<8x32xf32>
    %418 = vector.extract_strided_slice %413 {offsets = [0, 64], sizes = [8, 32], strides = [1, 1]} : vector<8x96xf32> to vector<8x32xf32>
    %419 = arith.mulf %417, %378 : vector<8x32xf32>
    %420 = arith.mulf %416, %415 : vector<8x32xf32>
    %421 = arith.addf %419, %420 : vector<8x32xf32>
    %422 = math.tanh %421 : vector<8x32xf32>
    %423 = arith.mulf %418, %422 : vector<8x32xf32>
    %424 = arith.truncf %423 : vector<8x32xf32> to vector<8x32xbf16>
    %cst_64 = arith.constant dense<0.000000e+00> : vector<8x128xf32>
    %425 = tpu.matmul %424, %1, %cst_64 {dimension_numbers = #tpu.dot_dimension_numbers<[1], [0], [0], [1], [0, 0, 1, 1], [], []>} : vector<8x32xbf16>, vector<32x128xbf16>, vector<8x128xf32> -> vector<8x128xf32>
    %426 = arith.addf %425, %2 : vector<8x128xf32>
    %cst_65 = arith.constant dense<0xFF800000> : vector<8xf32>
    %427 = vector.multi_reduction <maximumf>, %426, %cst_65 [1] : vector<8x128xf32> to vector<8xf32>
    %428 = vector.shape_cast %427 : vector<8xf32> to vector<8x1xf32>
    %429 = vector.broadcast %428 : vector<8x1xf32> to vector<8x128xf32>
    %430 = arith.cmpf oeq, %426, %429 : vector<8x128xf32>
    %c128_i32_66 = arith.constant 128 : i32
    %431 = vector.broadcast %c128_i32_66 : i32 to vector<8x128xi32>
    %432 = arith.select %430, %5, %431 : vector<8x128xi1>, vector<8x128xi32>
    %cst_67 = arith.constant dense<2147483647> : vector<8xi32>
    %433 = vector.multi_reduction <minsi>, %432, %cst_67 [1] : vector<8x128xi32> to vector<8xi32>
    %434 = vector.shape_cast %433 : vector<8xi32> to vector<8x1xi32>
    %435 = vector.broadcast %c9_i32 : i32 to vector<8x128xi32>
    %436 = arith.cmpi eq, %5, %435 : vector<8x128xi32>
    %437 = vector.shape_cast %434 : vector<8x1xi32> to vector<8x1xi32>
    %438 = vector.broadcast %437 : vector<8x1xi32> to vector<8x128xi32>
    %439 = arith.select %436, %438, %396 : vector<8x128xi1>, vector<8x128xi32>
    %c10_i32 = arith.constant 10 : i32
    %c0_68 = arith.constant 0 : index
    %c0_69 = arith.constant 0 : index
    %440 = vector.load %arg4[%c0_68, %c0_69] : memref<8x128xi32, #tpu.memory_space<vmem>>, vector<8x128xi32>
    tpu.vector_store %arg4[%c0_68, %c0_69], %439 {strides = array<i32>} : memref<8x128xi32, #tpu.memory_space<vmem>>, vector<8x128xi32>,
    return
  }
}

</mosaic_0001>

<bundles_post_ra>
// kernel: use_term_generator_forward.1
= control target key start
LH: loop header
LB: loop body
LE: loop exit
PB: predicated region body
PF: predicated region fallthrough
CT: control target
= control target key end

     0   :  { %v39_v0 = vlaneseq  ;;  %s1340_s19 = smov 32   ;;  %v1341_v5 = vmov 0.0   ;;  %s1342_s23 = smov 64   ;;  %vm53_vm1 = vcmask 261120   ;;  %vm55_vm2 = vcmask 523264   ;;  %s1789_s0 = inlined_call_operand.vmem [shape: f32[8,32], index: 0, kind: input, shape index: {}]   ;;  %s1790_s1 = inlined_call_operand.vmem [shape: bf16[128,128], index: 1, kind: input, shape index: {}]   ;;  %s1791_s2 = inlined_call_operand.vmem [shape: bf16[32,128], index: 2, kind: input, shape index: {}]   ;;  %s1792_s3 = inlined_call_operand.vmem [shape: f32[8,128], index: 3, kind: input, shape index: {}]   ;;  %s1793_s4 = inlined_call_operand.vmem [shape: s32[8,128], index: 4, kind: output, shape index: {}]  }
   0x1   :  { %v41_v1 = vld [vmem:[%s1789_s0] sm:$0xff]  ;;  %v1375_v2 = vld [vmem:[%s1790_s1 + $0x38] sm:$0xff]  ;;  %v1384_v4 = vld [vmem:[%s1790_s1 + $0x30] sm:$0xff]  ;;  %s1343_s12 = smov 96  }
   0x2   :  { %46 = vrot.lane.b32.xlu0 %v41_v1, %s1340_s19  ;;  %v1378_v3 = vand.u32 127, %v39_v0  ;;  %106 = vmatpush.bf16.msra.mxu0 %v1375_v2  ;;  %v1395_v7 = vld [vmem:[%s1790_s1 + $0x28] sm:$0xff]  ;;  %v1403_v8 = vld [vmem:[%s1790_s1 + $0x20] sm:$0xff]  ;;  %v1410_v9 = vld [vmem:[%s1790_s1 + $0x18] sm:$0xff] }
   0x3   :  { %224 = vmatpush.bf16.msra.mxu2 %v1375_v2  ;;  %v1418_v10 = vld [vmem:[%s1790_s1 + $0x10] sm:$0xff]  ;;  %v1424_v11 = vld [vmem:[%s1790_s1 + $0x8] sm:$0xff]  ;;  %v1432_v12 = vld [vmem:[%s1790_s1] sm:$0xff] }
   0x4   :  { %vm42_vm0 = vcmp.eq.s32.totalorder %v1378_v3, 0  ;;  %v1463_v40 = vld [vmem:[%s1791_s2 + $0x8] sm:$0xff]  ;;  %v1469_v41 = vld [vmem:[%s1791_s2] sm:$0xff]  ;;  %vm210_vm8 = vcmp.eq.s32.totalorder %v1378_v3, 1 }
   0x5   :  { %v1166_v6 = vsel %vm42_vm0, 1.0, %v1341_v5  ;;  %181 = vmatpush.bf16.msra.mxu1 %v1463_v40  ;;  %287 = vmatpush.bf16.msra.mxu3 %v1463_v40  ;;  %v1493_v46 = vld [vmem:[%s1792_s3] sm:$0xff]  ;;  %v1210_v54 = vsel %vm210_vm8, 1.0, %v1341_v5 }
   0x6   :  { %107 = vmatpush.bf16.msra.mxu0 %v1384_v4 }
   0x7   :  { %225 = vmatpush.bf16.msra.mxu2 %v1384_v4 }
   0x9   :  { %182 = vmatpush.bf16.msra.mxu1 %v1469_v41  ;;  %288 = vmatpush.bf16.msra.mxu3 %v1469_v41 }
   0xa   :  { %50 = vrot.lane.b32.xlu0 %v1166_v6, %s1342_s23  ;;  %108 = vmatpush.bf16.msra.mxu0 %v1395_v7 }
   0xb   :  { %226 = vmatpush.bf16.msra.mxu2 %v1395_v7 }
   0xd   :  { %330 = vmatpush.bf16.msrb.mxu1 %v1375_v2  ;;  %393 = vmatpush.bf16.msrb.mxu3 %v1463_v40 }
   0xe   :  { %109 = vmatpush.bf16.msra.mxu0 %v1403_v8 }
   0xf   :  { %227 = vmatpush.bf16.msra.mxu2 %v1403_v8 }
  0x11   :  { %331 = vmatpush.bf16.msrb.mxu1 %v1384_v4  ;;  %394 = vmatpush.bf16.msrb.mxu3 %v1469_v41 }
  0x12   :  { %110 = vmatpush.bf16.msra.mxu0 %v1410_v9 }
  0x13   :  { %228 = vmatpush.bf16.msra.mxu2 %v1410_v9 }
  0x15   :  { %332 = vmatpush.bf16.msrb.mxu1 %v1395_v7 }
  0x16   :  { %111 = vmatpush.bf16.msra.mxu0 %v1418_v10 }
  0x17   :  { %229 = vmatpush.bf16.msra.mxu2 %v1418_v10 }
  0x19   :  { %333 = vmatpush.bf16.msrb.mxu1 %v1403_v8 }
  0x1a   :  { %112 = vmatpush.bf16.msra.mxu0 %v1424_v11 }
  0x1b   :  { %230 = vmatpush.bf16.msra.mxu2 %v1424_v11 }
  0x1d   :  { %334 = vmatpush.bf16.msrb.mxu1 %v1410_v9 }
  0x1e   :  { %113 = vmatpush.bf16.msra.mxu0 %v1432_v12 }
  0x1f   :  { %231 = vmatpush.bf16.msra.mxu2 %v1432_v12 }
  0x21   :  { %335 = vmatpush.bf16.msrb.mxu1 %v1418_v10 }
  0x22   :  { %648 = vmatpush.bf16.msrb.mxu0 %v1375_v2 }
  0x23   :  { %542 = vmatpush.bf16.msrb.mxu2 %v1375_v2 }
  0x25   :  { %336 = vmatpush.bf16.msrb.mxu1 %v1424_v11 }
  0x26   :  { %649 = vmatpush.bf16.msrb.mxu0 %v1384_v4 }
  0x27   :  { %543 = vmatpush.bf16.msrb.mxu2 %v1384_v4 }
  0x29   :  { %337 = vmatpush.bf16.msrb.mxu1 %v1432_v12 }
  0x2a   :  { %650 = vmatpush.bf16.msrb.mxu0 %v1395_v7 }
  0x2b   :  { %544 = vmatpush.bf16.msrb.mxu2 %v1395_v7 }
  0x2e   :  { %651 = vmatpush.bf16.msrb.mxu0 %v1403_v8 }
  0x2f   :  { %545 = vmatpush.bf16.msrb.mxu2 %v1403_v8 }
  0x32   :  { %652 = vmatpush.bf16.msrb.mxu0 %v1410_v9 }
  0x33   :  { %546 = vmatpush.bf16.msrb.mxu2 %v1410_v9 }
  0x36   :  { %653 = vmatpush.bf16.msrb.mxu0 %v1418_v10 }
  0x37   :  { %547 = vmatpush.bf16.msrb.mxu2 %v1418_v10 }
  0x3a   :  { %654 = vmatpush.bf16.msrb.mxu0 %v1424_v11 }
  0x3b   :  { %548 = vmatpush.bf16.msrb.mxu2 %v1424_v11 }
  0x3e   :  { %655 = vmatpush.bf16.msrb.mxu0 %v1432_v12 }
  0x3f   :  { %549 = vmatpush.bf16.msrb.mxu2 %v1432_v12 }
  0x74   :  { %v47_v13 = vpop.permute.xlu0 %46 }
  0x75   :  { %v54_v14 = vsel %vm53_vm1, %v1166_v6, %v47_v13 }
  0x7c   :  { %v51_v15 = vpop.permute.xlu0 %50 }
  0x7d   :  { %v56_v16 = vsel %vm55_vm2, %v54_v14, %v51_v15 }
  0x7e   :  { %v57_v17 = vpack.c.bf16 %v56_v16, %v56_v16 }
  0x80   :  { %114 = vmatmul.bf16.vlgmr.msra.gmra.mxu0 %v57_v17 }
  0x81   :  { %923 = vmatpush.bf16.msra.mxu0 %v1463_v40 }
  0x85   :  { %924 = vmatpush.bf16.msra.mxu0 %v1469_v41 }
  0xfd   :  { %v115_v18 = vpop.f32.mrf.mxu0 }
  0xfe   :  { %1259 = vtanh.f32 %v115_v18  ;;  %v1199_v21 = vmul.f32 -1.442695, %v115_v18 }
 0x100   :  { %1261 = vpow2.f32 %v1199_v21 }
 0x104   :  { %v1260_v19 = vpop.eup %1259 }
 0x105   :  { %141 = vrot.lane.b32.xlu1 %v1260_v19, %s1340_s19  ;;  %v117_v20 = vpop.f32.mrf.mxu0 }
 0x106   :  { %v1262_v22 = vpop.eup %1261 }
 0x107   :  { %v122_v23 = vadd.f32 1.0, %v1262_v22 }
 0x109   :  { %1263 = vrcp.f32 %v122_v23  ;;  %v134_v29 = vand.u32 2147483648, %v122_v23  ;;  %vm128_vm4 = vweird.f32 %v122_v23  ;;  %v132_v30 = vand.u32 2147483647, %v122_v23 }
 0x10b   :  { %v135_v32 = vor.u32 1.1754944e-38, %v134_v29  ;;  %vm133_vm6 = vcmp.eq.f32.partialorder %v132_v30, 8.507059e+37 }
 0x10f   :  { %v1264_v24 = vpop.eup %1263 }
 0x110   :  { %v124_v25 = vmul.f32 %v1264_v24, %v122_v23  ;;  %vm129_vm3 = vweird.f32 %v1264_v24 }
 0x111   :  { %vm130_vm5 = vmor %vm128_vm4, %vm129_vm3  ;;  %vm316_vm3 = vcmp.eq.s32.totalorder %v1378_v3, 2 }
 0x112   :  { %v125_v26 = vsub.f32 1.0, %v124_v25 }
 0x114   :  { %v126_v27 = vmul.f32 %v1264_v24, %v125_v26 }
 0x116   :  { %v127_v28 = vadd.f32 %v1264_v24, %v126_v27 }
 0x118   :  { %v131_v31 = vsel %vm130_vm5, %v1264_v24, %v127_v28 }
 0x119   :  { %v136_v34 = vsel %vm133_vm6, %v135_v32, %v131_v31 }
 0x11a   :  { %v139_v36 = vmul.f32 0.0, %v136_v34 }
 0x177   :  { %v142_v33 = vpop.permute.xlu1 %141 }
 0x178   :  { %v144_v35 = vmul.f32 %v142_v33, %v136_v34 }
 0x17a   :  { %146 = vrot.lane.b32.xlu1 %v144_v35, %s1340_s19 }
 0x1ec   :  { %v147_v37 = vpop.permute.xlu1 %146 }
 0x1ed   :  { %v1456_v38 = vadd.f32 %v147_v37, %v139_v36 }
 0x1ef   :  { %1265 = vtanh.f32 %v1456_v38 }
 0x1f5   :  { %v1266_v39 = vpop.eup %1265 }
 0x1f6   :  { %152 = vrot.lane.b32.xlu2 %v1266_v39, %s1340_s19 }
 0x250   :  { %v153_v42 = vpop.permute.xlu2 %152 }
 0x251   :  { %v155_v43 = vmul.f32 %v153_v42, %v136_v34 }
 0x253   :  { %v156_v44 = vpack.c.bf16 %v155_v43, %v155_v43 }
 0x255   :  { %158 = vrot.lane.b32.xlu2 %v156_v44, %s1342_s23 }
 0x2af   :  { %v159_v45 = vpop.permute.xlu2 %158 }
 0x2b0   :  { %1208 = vmatmul.msk.bf16.vlgmr.msra.gmra.mxu1 %vm53_vm1, %v159_v45 }
 0x2b1   :  { %605 = vmatpush.bf16.msra.mxu1 %v1463_v40 }
 0x2b5   :  { %606 = vmatpush.bf16.msra.mxu1 %v1469_v41 }
 0x32d   :  { %v184_v47 = vpop.f32.mrf.mxu1 }
 0x32e   :  { %v185_v48 = vadd.f32 %v184_v47, %v1493_v46 }
 0x330   :  { %188 = vmax.xlane.f32.xlu0 %v185_v48 }
 0x335   :  { %v186_v49 = vpop.f32.mrf.mxu1 }
 0x344   :  { %218 = vrot.lane.b32.xlu0 %v1210_v54, %s1342_s23 }
 0x3a3   :  { %v189_v50 = vpop.xlane.xlu0 %188 }
 0x3a4   :  { %vm190_vm7 = vcmp.eq.f32.partialorder %v185_v48, %v189_v50 }
 0x3a5   :  { %v191_v51 = vsel %vm190_vm7, %v1378_v3, 128 }
 0x3a6   :  { %v193_v52 = vshra.s32 %v191_v51, 16  ;;  %v192_v55 = vand.u32 65535, %v191_v51 }
 0x3a8   :  { %v195_v53 = vcvt.s32.f32 %v193_v52  ;;  %v194_v57 = vcvt.s32.f32 %v192_v55  ;;  %v1214_v52 = vsel %vm316_vm3, 1.0, %v1341_v5 }
 0x3aa   :  { %196 = vmin.xlane.f32.xlu1 %v195_v53 }
 0x3b6   :  { %v219_v0 = vpop.permute.xlu0 %218 }
 0x41d   :  { %v197_v56 = vpop.xlane.xlu1 %196 }
 0x41e   :  { %vm198_vm9 = vcmp.eq.f32.partialorder %v195_v53, %v197_v56  ;;  %v203_v59 = vcvt.f32.s32 %v197_v56 }
 0x41f   :  { %v199_v58 = vsel %vm198_vm9, %v194_v57, inf }
 0x420   :  { %200 = vmin.xlane.f32.xlu2 %v199_v58  ;;  %v204_v61 = vshll.u32 %v203_v59, 16 }
 0x438   :  { %214 = vrot.lane.b32.xlu2 %v155_v43, %s1343_s12 }
 0x493   :  { %v201_v60 = vpop.xlane.xlu2 %200 }
 0x494   :  { %v202_v62 = vcvt.f32.s32 %v201_v60 }
 0x496   :  { %v1503_v63 = vadd.s32 %v204_v61, %v202_v62 }
 0x498   :  { %vm207_vm10 = vcmp.eq.s32.totalorder %v1378_v3, %v1503_v63  ;;  %v206_v62 = vsel %vm42_vm0, %v1503_v63, 0 }
 0x499   :  { %v1209_v1 = vsel %vm207_vm10, 1.0, %v1341_v5  ;;  %vm422_vm10 = vcmp.eq.s32.totalorder %v1378_v3, 3 }
 0x49b   :  { %v215_v6 = vpop.permute.xlu2 %214 }
 0x49c   :  { %v221_v13 = vsel %vm53_vm1, %v1209_v1, %v215_v6 }
 0x49d   :  { %v222_v14 = vsel %vm55_vm2, %v221_v13, %v219_v0 }
 0x49e   :  { %v223_v15 = vpack.c.bf16 %v222_v14, %v222_v14 }
 0x4a0   :  { %232 = vmatmul.bf16.vlgmr.msra.gmra.mxu2 %v223_v15 }
 0x4a1   :  { %817 = vmatpush.bf16.msra.mxu2 %v1463_v40 }
 0x4a5   :  { %818 = vmatpush.bf16.msra.mxu2 %v1469_v41 }
 0x523   :  { %v233_v16 = vpop.f32.mrf.mxu2 }
 0x524   :  { %1267 = vtanh.f32 %v233_v16  ;;  %v1211_v19 = vmul.f32 -1.442695, %v233_v16 }
 0x526   :  { %1269 = vpow2.f32 %v1211_v19 }
 0x52a   :  { %v1268_v17 = vpop.eup %1267 }
 0x52b   :  { %259 = vrot.lane.b32.xlu1 %v1268_v17, %s1340_s19  ;;  %v235_v18 = vpop.f32.mrf.mxu2 }
 0x52c   :  { %v1270_v20 = vpop.eup %1269 }
 0x52d   :  { %v240_v21 = vadd.f32 1.0, %v1270_v20 }
 0x52f   :  { %1271 = vrcp.f32 %v240_v21  ;;  %v252_v27 = vand.u32 2147483648, %v240_v21  ;;  %vm246_vm12 = vweird.f32 %v240_v21  ;;  %v250_v28 = vand.u32 2147483647, %v240_v21 }
 0x531   :  { %v253_v30 = vor.u32 1.1754944e-38, %v252_v27  ;;  %vm251_vm14 = vcmp.eq.f32.partialorder %v250_v28, 8.507059e+37 }
 0x535   :  { %v1272_v22 = vpop.eup %1271 }
 0x536   :  { %v242_v23 = vmul.f32 %v1272_v22, %v240_v21  ;;  %vm247_vm11 = vweird.f32 %v1272_v22 }
 0x537   :  { %vm248_vm13 = vmor %vm246_vm12, %vm247_vm11 }
 0x538   :  { %v243_v24 = vsub.f32 1.0, %v242_v23 }
 0x53a   :  { %v244_v25 = vmul.f32 %v1272_v22, %v243_v24 }
 0x53c   :  { %v245_v26 = vadd.f32 %v1272_v22, %v244_v25 }
 0x53e   :  { %v249_v29 = vsel %vm248_vm13, %v1272_v22, %v245_v26 }
 0x53f   :  { %v254_v32 = vsel %vm251_vm14, %v253_v30, %v249_v29 }
 0x540   :  { %v257_v34 = vmul.f32 %v254_v32, %v1456_v38 }
 0x59d   :  { %v260_v31 = vpop.permute.xlu1 %259 }
 0x59e   :  { %v262_v33 = vmul.f32 %v260_v31, %v254_v32 }
 0x5a0   :  { %264 = vrot.lane.b32.xlu0 %v262_v33, %s1340_s19 }
 0x612   :  { %v265_v35 = vpop.permute.xlu0 %264 }
 0x613   :  { %v1515_v36 = vadd.f32 %v265_v35, %v257_v34 }
 0x615   :  { %1273 = vtanh.f32 %v1515_v36 }
 0x61b   :  { %v1274_v37 = vpop.eup %1273 }
 0x61c   :  { %270 = vrot.lane.b32.xlu2 %v1274_v37, %s1340_s19 }
 0x676   :  { %v271_v39 = vpop.permute.xlu2 %270 }
 0x677   :  { %v273_v42 = vmul.f32 %v271_v39, %v254_v32 }
 0x679   :  { %v274_v43 = vpack.c.bf16 %v273_v42, %v273_v42 }
 0x67b   :  { %276 = vrot.lane.b32.xlu1 %v274_v43, %s1342_s23 }
 0x6ed   :  { %v277_v44 = vpop.permute.xlu1 %276 }
 0x6ee   :  { %1212 = vmatmul.msk.bf16.vlgmr.msra.gmra.mxu3 %vm53_vm1, %v277_v44 }
 0x6ef   :  { %436 = vmatpush.bf16.msra.mxu3 %v1375_v2 }
 0x6f3   :  { %437 = vmatpush.bf16.msra.mxu3 %v1384_v4 }
 0x6f7   :  { %438 = vmatpush.bf16.msra.mxu3 %v1395_v7 }
 0x6fb   :  { %439 = vmatpush.bf16.msra.mxu3 %v1403_v8 }
 0x6ff   :  { %440 = vmatpush.bf16.msra.mxu3 %v1410_v9 }
 0x703   :  { %441 = vmatpush.bf16.msra.mxu3 %v1418_v10 }
 0x707   :  { %442 = vmatpush.bf16.msra.mxu3 %v1424_v11 }
 0x70b   :  { %443 = vmatpush.bf16.msra.mxu3 %v1432_v12 }
 0x771   :  { %v290_v38 = vpop.f32.mrf.mxu3 }
 0x772   :  { %v291_v45 = vadd.f32 %v290_v38, %v1493_v46 }
 0x774   :  { %294 = vmax.xlane.f32.xlu0 %v291_v45 }
 0x779   :  { %v292_v47 = vpop.f32.mrf.mxu3 }
 0x788   :  { %320 = vrot.lane.b32.xlu0 %v273_v42, %s1343_s12 }
 0x7e7   :  { %v295_v48 = vpop.xlane.xlu0 %294 }
 0x7e8   :  { %vm296_vm15 = vcmp.eq.f32.partialorder %v291_v45, %v295_v48 }
 0x7e9   :  { %v297_v49 = vsel %vm296_vm15, %v1378_v3, 128 }
 0x7ea   :  { %v299_v50 = vshra.s32 %v297_v49, 16  ;;  %v298_v53 = vand.u32 65535, %v297_v49 }
 0x7ec   :  { %v301_v51 = vcvt.s32.f32 %v299_v50  ;;  %v300_v55 = vcvt.s32.f32 %v298_v53 }
 0x7ee   :  { %302 = vmin.xlane.f32.xlu2 %v301_v51 }
 0x7fa   :  { %v321_v6 = vpop.permute.xlu0 %320 }
 0x806   :  { %324 = vrot.lane.b32.xlu2 %v1214_v52, %s1342_s23  ;;  %v1218_v52 = vsel %vm422_vm10, 1.0, %v1341_v5 }
 0x861   :  { %v303_v54 = vpop.xlane.xlu2 %302 }
 0x862   :  { %vm304_vm4 = vcmp.eq.f32.partialorder %v301_v51, %v303_v54  ;;  %v309_v57 = vcvt.f32.s32 %v303_v54 }
 0x863   :  { %v305_v56 = vsel %vm304_vm4, %v300_v55, inf }
 0x864   :  { %306 = vmin.xlane.f32.xlu1 %v305_v56  ;;  %v310_v59 = vshll.u32 %v309_v57, 16 }
 0x869   :  { %v325_v1 = vpop.permute.xlu2 %324 }
 0x8d7   :  { %v307_v58 = vpop.xlane.xlu1 %306 }
 0x8d8   :  { %v308_v60 = vcvt.f32.s32 %v307_v58 }
 0x8da   :  { %v311_v61 = vadd.s32 %v310_v59, %v308_v60 }
 0x8dc   :  { %v1542_v0 = vsel %vm210_vm8, %v311_v61, %v206_v62  ;;  %vm313_vm5 = vcmp.eq.s32.totalorder %v1378_v3, %v311_v61 }
 0x8dd   :  { %v1213_v13 = vsel %vm313_vm5, 1.0, %v1341_v5  ;;  %vm528_vm5 = vcmp.eq.s32.totalorder %v1378_v3, 4 }
 0x8de   :  { %v327_v14 = vsel %vm53_vm1, %v1213_v13, %v321_v6 }
 0x8df   :  { %v328_v15 = vsel %vm55_vm2, %v327_v14, %v325_v1 }
 0x8e0   :  { %v329_v16 = vpack.c.bf16 %v328_v15, %v328_v15 }
 0x8e2   :  { %338 = vmatmul.bf16.vlgmr.msrb.gmra.mxu1 %v329_v16 }
 0x8e3   :  { %711 = vmatpush.bf16.msrb.mxu1 %v1463_v40 }
 0x8e7   :  { %712 = vmatpush.bf16.msrb.mxu1 %v1469_v41 }
 0x95f   :  { %v339_v63 = vpop.f32.mrf.mxu1 }
 0x960   :  { %1275 = vtanh.f32 %v339_v63  ;;  %v1215_v19 = vmul.f32 -1.442695, %v339_v63 }
 0x962   :  { %1277 = vpow2.f32 %v1215_v19 }
 0x966   :  { %v1276_v17 = vpop.eup %1275 }
 0x967   :  { %365 = vrot.lane.b32.xlu1 %v1276_v17, %s1340_s19  ;;  %v341_v18 = vpop.f32.mrf.mxu1 }
 0x968   :  { %v1278_v20 = vpop.eup %1277 }
 0x969   :  { %v346_v21 = vadd.f32 1.0, %v1278_v20 }
 0x96b   :  { %1279 = vrcp.f32 %v346_v21  ;;  %v358_v27 = vand.u32 2147483648, %v346_v21  ;;  %vm352_vm6 = vweird.f32 %v346_v21  ;;  %v356_v28 = vand.u32 2147483647, %v346_v21 }
 0x96d   :  { %v359_v30 = vor.u32 1.1754944e-38, %v358_v27  ;;  %vm357_vm8 = vcmp.eq.f32.partialorder %v356_v28, 8.507059e+37 }
 0x971   :  { %v1280_v22 = vpop.eup %1279 }
 0x972   :  { %v348_v23 = vmul.f32 %v1280_v22, %v346_v21  ;;  %vm353_vm0 = vweird.f32 %v1280_v22 }
 0x973   :  { %vm354_vm7 = vmor %vm352_vm6, %vm353_vm0 }
 0x974   :  { %v349_v24 = vsub.f32 1.0, %v348_v23 }
 0x976   :  { %v350_v25 = vmul.f32 %v1280_v22, %v349_v24 }
 0x978   :  { %v351_v26 = vadd.f32 %v1280_v22, %v350_v25 }
 0x97a   :  { %v355_v29 = vsel %vm354_vm7, %v1280_v22, %v351_v26 }
 0x97b   :  { %v360_v32 = vsel %vm357_vm8, %v359_v30, %v355_v29 }
 0x97c   :  { %v363_v34 = vmul.f32 %v360_v32, %v1515_v36 }
 0x9d9   :  { %v366_v31 = vpop.permute.xlu1 %365 }
 0x9da   :  { %v368_v33 = vmul.f32 %v366_v31, %v360_v32 }
 0x9dc   :  { %370 = vrot.lane.b32.xlu0 %v368_v33, %s1340_s19 }
 0xa4e   :  { %v371_v35 = vpop.permute.xlu0 %370 }
 0xa4f   :  { %v1553_v37 = vadd.f32 %v371_v35, %v363_v34 }
 0xa51   :  { %1281 = vtanh.f32 %v1553_v37 }
 0xa57   :  { %v1282_v39 = vpop.eup %1281 }
 0xa58   :  { %376 = vrot.lane.b32.xlu2 %v1282_v39, %s1340_s19 }
 0xab2   :  { %v377_v42 = vpop.permute.xlu2 %376 }
 0xab3   :  { %v379_v43 = vmul.f32 %v377_v42, %v360_v32 }
 0xab5   :  { %v380_v44 = vpack.c.bf16 %v379_v43, %v379_v43 }
 0xab7   :  { %382 = vrot.lane.b32.xlu0 %v380_v44, %s1342_s23 }
 0xb29   :  { %v383_v38 = vpop.permute.xlu0 %382 }
 0xb2a   :  { %1216 = vmatmul.msk.bf16.vlgmr.msrb.gmra.mxu3 %vm53_vm1, %v383_v38 }
 0xb2b   :  { %499 = vmatpush.bf16.msrb.mxu3 %v1463_v40 }
 0xb2f   :  { %500 = vmatpush.bf16.msrb.mxu3 %v1469_v41 }
 0xbad   :  { %v396_v36 = vpop.f32.mrf.mxu3 }
 0xbae   :  { %v397_v45 = vadd.f32 %v396_v36, %v1493_v46 }
 0xbb0   :  { %400 = vmax.xlane.f32.xlu1 %v397_v45 }
 0xbb5   :  { %v398_v47 = vpop.f32.mrf.mxu3 }
 0xbc9   :  { %426 = vrot.lane.b32.xlu1 %v379_v43, %s1343_s12 }
 0xc23   :  { %v401_v48 = vpop.xlane.xlu1 %400 }
 0xc24   :  { %vm402_vm9 = vcmp.eq.f32.partialorder %v397_v45, %v401_v48 }
 0xc25   :  { %v403_v49 = vsel %vm402_vm9, %v1378_v3, 128 }
 0xc26   :  { %v405_v50 = vshra.s32 %v403_v49, 16  ;;  %v404_v53 = vand.u32 65535, %v403_v49 }
 0xc28   :  { %v407_v51 = vcvt.s32.f32 %v405_v50  ;;  %v406_v55 = vcvt.s32.f32 %v404_v53 }
 0xc2a   :  { %408 = vmin.xlane.f32.xlu2 %v407_v51 }
 0xc3b   :  { %v427_v6 = vpop.permute.xlu1 %426 }
 0xc42   :  { %430 = vrot.lane.b32.xlu2 %v1218_v52, %s1342_s23 }
 0xc9d   :  { %v409_v54 = vpop.xlane.xlu2 %408 }
 0xc9e   :  { %vm410_vm11 = vcmp.eq.f32.partialorder %v407_v51, %v409_v54  ;;  %v415_v57 = vcvt.f32.s32 %v409_v54  ;;  %v1222_v51 = vsel %vm528_vm5, 1.0, %v1341_v5 }
 0xc9f   :  { %v411_v56 = vsel %vm410_vm11, %v406_v55, inf }
 0xca0   :  { %412 = vmin.xlane.f32.xlu0 %v411_v56  ;;  %v416_v59 = vshll.u32 %v415_v57, 16 }
 0xca5   :  { %v431_v1 = vpop.permute.xlu2 %430 }
 0xd13   :  { %v413_v58 = vpop.xlane.xlu0 %412 }
 0xd14   :  { %v414_v60 = vcvt.f32.s32 %v413_v58 }
 0xd16   :  { %v417_v61 = vadd.s32 %v416_v59, %v414_v60 }
 0xd18   :  { %v1572_v62 = vsel %vm316_vm3, %v417_v61, %v1542_v0  ;;  %vm419_vm12 = vcmp.eq.s32.totalorder %v1378_v3, %v417_v61 }
 0xd19   :  { %v1217_v13 = vsel %vm419_vm12, 1.0, %v1341_v5 }
 0xd1a   :  { %v433_v14 = vsel %vm53_vm1, %v1217_v13, %v427_v6 }
 0xd1b   :  { %v434_v15 = vsel %vm55_vm2, %v433_v14, %v431_v1 }
 0xd1c   :  { %v435_v16 = vpack.c.bf16 %v434_v15, %v434_v15 }
 0xd1e   :  { %444 = vmatmul.bf16.vlgmr.msra.gmra.mxu3 %v435_v16 }
 0xd1f   :  { %754 = vmatpush.bf16.msra.mxu3 %v1375_v2 }
 0xd23   :  { %755 = vmatpush.bf16.msra.mxu3 %v1384_v4 }
 0xd27   :  { %756 = vmatpush.bf16.msra.mxu3 %v1395_v7 }
 0xd2b   :  { %757 = vmatpush.bf16.msra.mxu3 %v1403_v8 }
 0xd2f   :  { %758 = vmatpush.bf16.msra.mxu3 %v1410_v9 }
 0xd33   :  { %759 = vmatpush.bf16.msra.mxu3 %v1418_v10 }
 0xd37   :  { %760 = vmatpush.bf16.msra.mxu3 %v1424_v11 }
 0xd3b   :  { %761 = vmatpush.bf16.msra.mxu3 %v1432_v12 }
 0xda1   :  { %v445_v0 = vpop.f32.mrf.mxu3 }
 0xda2   :  { %1283 = vtanh.f32 %v445_v0  ;;  %v1219_v18 = vmul.f32 -1.442695, %v445_v0 }
 0xda4   :  { %1285 = vpow2.f32 %v1219_v18 }
 0xda8   :  { %v1284_v63 = vpop.eup %1283 }
 0xda9   :  { %471 = vrot.lane.b32.xlu0 %v1284_v63, %s1340_s19  ;;  %v447_v17 = vpop.f32.mrf.mxu3 }
 0xdaa   :  { %v1286_v19 = vpop.eup %1285 }
 0xdab   :  { %v452_v20 = vadd.f32 1.0, %v1286_v19 }
 0xdad   :  { %1287 = vrcp.f32 %v452_v20  ;;  %v464_v26 = vand.u32 2147483648, %v452_v20  ;;  %vm458_vm14 = vweird.f32 %v452_v20  ;;  %v462_v27 = vand.u32 2147483647, %v452_v20 }
 0xdaf   :  { %v465_v29 = vor.u32 1.1754944e-38, %v464_v26  ;;  %vm463_vm3 = vcmp.eq.f32.partialorder %v462_v27, 8.507059e+37 }
 0xdb3   :  { %v1288_v21 = vpop.eup %1287 }
 0xdb4   :  { %v454_v22 = vmul.f32 %v1288_v21, %v452_v20  ;;  %vm459_vm13 = vweird.f32 %v1288_v21 }
 0xdb5   :  { %vm460_vm15 = vmor %vm458_vm14, %vm459_vm13  ;;  %vm634_vm13 = vcmp.eq.s32.totalorder %v1378_v3, 5 }
 0xdb6   :  { %v455_v23 = vsub.f32 1.0, %v454_v22 }
 0xdb8   :  { %v456_v24 = vmul.f32 %v1288_v21, %v455_v23 }
 0xdba   :  { %v457_v25 = vadd.f32 %v1288_v21, %v456_v24 }
 0xdbc   :  { %v461_v28 = vsel %vm460_vm15, %v1288_v21, %v457_v25 }
 0xdbd   :  { %v466_v31 = vsel %vm463_vm3, %v465_v29, %v461_v28 }
 0xdbe   :  { %v469_v33 = vmul.f32 %v466_v31, %v1553_v37 }
 0xe1b   :  { %v472_v30 = vpop.permute.xlu0 %471 }
 0xe1c   :  { %v474_v32 = vmul.f32 %v472_v30, %v466_v31 }
 0xe1e   :  { %476 = vrot.lane.b32.xlu1 %v474_v32, %s1340_s19 }
 0xe90   :  { %v477_v34 = vpop.permute.xlu1 %476 }
 0xe91   :  { %v1589_v35 = vadd.f32 %v477_v34, %v469_v33 }
 0xe93   :  { %1289 = vtanh.f32 %v1589_v35 }
 0xe99   :  { %v1290_v39 = vpop.eup %1289 }
 0xe9a   :  { %482 = vrot.lane.b32.xlu0 %v1290_v39, %s1340_s19 }
 0xf0c   :  { %v483_v42 = vpop.permute.xlu0 %482 }
 0xf0d   :  { %v485_v43 = vmul.f32 %v483_v42, %v466_v31 }
 0xf0f   :  { %v486_v44 = vpack.c.bf16 %v485_v43, %v485_v43 }
 0xf11   :  { %488 = vrot.lane.b32.xlu2 %v486_v44, %s1342_s23 }
 0xf6b   :  { %v489_v38 = vpop.permute.xlu2 %488 }
 0xf6c   :  { %1220 = vmatmul.msk.bf16.vlgmr.msrb.gmra.mxu3 %vm53_vm1, %v489_v38 }
 0xf6d   :  { %1029 = vmatpush.bf16.msrb.mxu3 %v1463_v40 }
 0xf71   :  { %1030 = vmatpush.bf16.msrb.mxu3 %v1469_v41 }
 0xfef   :  { %v502_v37 = vpop.f32.mrf.mxu3 }
 0xff0   :  { %v503_v36 = vadd.f32 %v502_v37, %v1493_v46 }
 0xff2   :  { %506 = vmax.xlane.f32.xlu1 %v503_v36 }
 0xff7   :  { %v504_v45 = vpop.f32.mrf.mxu3 }
0x100b   :  { %532 = vrot.lane.b32.xlu1 %v485_v43, %s1343_s12 }
0x1065   :  { %v507_v47 = vpop.xlane.xlu1 %506 }
0x1066   :  { %vm508_vm4 = vcmp.eq.f32.partialorder %v503_v36, %v507_v47 }
0x1067   :  { %v509_v48 = vsel %vm508_vm4, %v1378_v3, 128 }
0x1068   :  { %v511_v49 = vshra.s32 %v509_v48, 16  ;;  %v510_v52 = vand.u32 65535, %v509_v48 }
0x106a   :  { %v513_v50 = vcvt.s32.f32 %v511_v49  ;;  %v512_v54 = vcvt.s32.f32 %v510_v52 }
0x106c   :  { %514 = vmin.xlane.f32.xlu0 %v513_v50 }
0x107d   :  { %v533_v6 = vpop.permute.xlu1 %532 }
0x1080   :  { %536 = vrot.lane.b32.xlu0 %v1222_v51, %s1342_s23 }
0x10df   :  { %v515_v53 = vpop.xlane.xlu0 %514 }
0x10e0   :  { %vm516_vm0 = vcmp.eq.f32.partialorder %v513_v50, %v515_v53  ;;  %v521_v56 = vcvt.f32.s32 %v515_v53 }
0x10e1   :  { %v517_v55 = vsel %vm516_vm0, %v512_v54, inf  ;;  %v1226_v54 = vsel %vm634_vm13, 1.0, %v1341_v5 }
0x10e2   :  { %518 = vmin.xlane.f32.xlu2 %v517_v55  ;;  %v522_v58 = vshll.u32 %v521_v56, 16 }
0x10f2   :  { %v537_v1 = vpop.permute.xlu0 %536 }
0x1155   :  { %v519_v57 = vpop.xlane.xlu2 %518 }
0x1156   :  { %v520_v59 = vcvt.f32.s32 %v519_v57 }
0x1158   :  { %v523_v60 = vadd.s32 %v522_v58, %v520_v59 }
0x115a   :  { %v1608_v61 = vsel %vm422_vm10, %v523_v60, %v1572_v62  ;;  %vm525_vm6 = vcmp.eq.s32.totalorder %v1378_v3, %v523_v60 }
0x115b   :  { %v1221_v13 = vsel %vm525_vm6, 1.0, %v1341_v5  ;;  %vm740_vm6 = vcmp.eq.s32.totalorder %v1378_v3, 6 }
0x115c   :  { %v539_v14 = vsel %vm53_vm1, %v1221_v13, %v533_v6 }
0x115d   :  { %v540_v15 = vsel %vm55_vm2, %v539_v14, %v537_v1 }
0x115e   :  { %v541_v16 = vpack.c.bf16 %v540_v15, %v540_v15 }
0x1160   :  { %550 = vmatmul.bf16.vlgmr.msrb.gmra.mxu2 %v541_v16 }
0x1161   :  { %966 = vmatpush.bf16.msrb.mxu2 %v1375_v2 }
0x1165   :  { %967 = vmatpush.bf16.msrb.mxu2 %v1384_v4 }
0x1169   :  { %968 = vmatpush.bf16.msrb.mxu2 %v1395_v7 }
0x116d   :  { %969 = vmatpush.bf16.msrb.mxu2 %v1403_v8 }
0x1171   :  { %970 = vmatpush.bf16.msrb.mxu2 %v1410_v9 }
0x1175   :  { %971 = vmatpush.bf16.msrb.mxu2 %v1418_v10 }
0x1179   :  { %972 = vmatpush.bf16.msrb.mxu2 %v1424_v11 }
0x117d   :  { %973 = vmatpush.bf16.msrb.mxu2 %v1432_v12 }
0x11e3   :  { %v551_v62 = vpop.f32.mrf.mxu2 }
0x11e4   :  { %1291 = vtanh.f32 %v551_v62  ;;  %v1223_v17 = vmul.f32 -1.442695, %v551_v62 }
0x11e6   :  { %1293 = vpow2.f32 %v1223_v17 }
0x11ea   :  { %v1292_v0 = vpop.eup %1291 }
0x11eb   :  { %577 = vrot.lane.b32.xlu2 %v1292_v0, %s1340_s19  ;;  %v553_v63 = vpop.f32.mrf.mxu2 }
0x11ec   :  { %v1294_v18 = vpop.eup %1293 }
0x11ed   :  { %v558_v19 = vadd.f32 1.0, %v1294_v18 }
0x11ef   :  { %1295 = vrcp.f32 %v558_v19  ;;  %v570_v25 = vand.u32 2147483648, %v558_v19  ;;  %vm564_vm8 = vweird.f32 %v558_v19  ;;  %v568_v26 = vand.u32 2147483647, %v558_v19 }
0x11f1   :  { %v571_v28 = vor.u32 1.1754944e-38, %v570_v25  ;;  %vm569_vm10 = vcmp.eq.f32.partialorder %v568_v26, 8.507059e+37 }
0x11f5   :  { %v1296_v20 = vpop.eup %1295 }
0x11f6   :  { %v560_v21 = vmul.f32 %v1296_v20, %v558_v19  ;;  %vm565_vm7 = vweird.f32 %v1296_v20 }
0x11f7   :  { %vm566_vm9 = vmor %vm564_vm8, %vm565_vm7 }
0x11f8   :  { %v561_v22 = vsub.f32 1.0, %v560_v21 }
0x11fa   :  { %v562_v23 = vmul.f32 %v1296_v20, %v561_v22 }
0x11fc   :  { %v563_v24 = vadd.f32 %v1296_v20, %v562_v23 }
0x11fe   :  { %v567_v27 = vsel %vm566_vm9, %v1296_v20, %v563_v24 }
0x11ff   :  { %v572_v30 = vsel %vm569_vm10, %v571_v28, %v567_v27 }
0x1200   :  { %v575_v32 = vmul.f32 %v572_v30, %v1589_v35 }
0x1245   :  { %v578_v29 = vpop.permute.xlu2 %577 }
0x1246   :  { %v580_v31 = vmul.f32 %v578_v29, %v572_v30 }
0x1248   :  { %582 = vrot.lane.b32.xlu0 %v580_v31, %s1340_s19 }
0x12ba   :  { %v583_v33 = vpop.permute.xlu0 %582 }
0x12bb   :  { %v1625_v34 = vadd.f32 %v583_v33, %v575_v32 }
0x12bd   :  { %1297 = vtanh.f32 %v1625_v34 }
0x12c3   :  { %v1298_v39 = vpop.eup %1297 }
0x12c4   :  { %588 = vrot.lane.b32.xlu1 %v1298_v39, %s1340_s19 }
0x1336   :  { %v589_v42 = vpop.permute.xlu1 %588 }
0x1337   :  { %v591_v43 = vmul.f32 %v589_v42, %v572_v30 }
0x1339   :  { %v592_v44 = vpack.c.bf16 %v591_v43, %v591_v43 }
0x133b   :  { %594 = vrot.lane.b32.xlu2 %v592_v44, %s1342_s23 }
0x1395   :  { %v595_v38 = vpop.permute.xlu2 %594 }
0x1396   :  { %1224 = vmatmul.msk.bf16.vlgmr.msra.gmra.mxu1 %vm53_vm1, %v595_v38 }
0x1397   :  { %860 = vmatpush.bf16.msra.mxu1 %v1375_v2 }
0x139b   :  { %861 = vmatpush.bf16.msra.mxu1 %v1384_v4 }
0x139f   :  { %862 = vmatpush.bf16.msra.mxu1 %v1395_v7 }
0x13a3   :  { %863 = vmatpush.bf16.msra.mxu1 %v1403_v8 }
0x13a7   :  { %864 = vmatpush.bf16.msra.mxu1 %v1410_v9 }
0x13ab   :  { %865 = vmatpush.bf16.msra.mxu1 %v1418_v10 }
0x13af   :  { %866 = vmatpush.bf16.msra.mxu1 %v1424_v11 }
0x13b3   :  { %867 = vmatpush.bf16.msra.mxu1 %v1432_v12 }
0x1413   :  { %v608_v35 = vpop.f32.mrf.mxu1 }
0x1414   :  { %v609_v37 = vadd.f32 %v608_v35, %v1493_v46 }
0x1416   :  { %612 = vmax.xlane.f32.xlu0 %v609_v37 }
0x141b   :  { %v610_v36 = vpop.f32.mrf.mxu1 }
0x142a   :  { %638 = vrot.lane.b32.xlu0 %v591_v43, %s1343_s12 }
0x1489   :  { %v613_v45 = vpop.xlane.xlu0 %612 }
0x148a   :  { %vm614_vm11 = vcmp.eq.f32.partialorder %v609_v37, %v613_v45 }
0x148b   :  { %v615_v47 = vsel %vm614_vm11, %v1378_v3, 128 }
0x148c   :  { %v617_v48 = vshra.s32 %v615_v47, 16  ;;  %v616_v50 = vand.u32 65535, %v615_v47 }
0x148e   :  { %v619_v49 = vcvt.s32.f32 %v617_v48  ;;  %v618_v52 = vcvt.s32.f32 %v616_v50 }
0x1490   :  { %620 = vmin.xlane.f32.xlu1 %v619_v49 }
0x149c   :  { %v639_v1 = vpop.permute.xlu0 %638 }
0x1503   :  { %v621_v51 = vpop.xlane.xlu1 %620 }
0x1504   :  { %vm622_vm12 = vcmp.eq.f32.partialorder %v619_v49, %v621_v51  ;;  %v627_v55 = vcvt.f32.s32 %v621_v51 }
0x1505   :  { %v623_v53 = vsel %vm622_vm12, %v618_v52, inf }
0x1506   :  { %624 = vmin.xlane.f32.xlu2 %v623_v53  ;;  %v628_v57 = vshll.u32 %v627_v55, 16 }
0x151e   :  { %642 = vrot.lane.b32.xlu2 %v1226_v54, %s1342_s23 }
0x1579   :  { %v625_v56 = vpop.xlane.xlu2 %624 }
0x157a   :  { %v626_v58 = vcvt.f32.s32 %v625_v56 }
0x157c   :  { %v629_v59 = vadd.s32 %v628_v57, %v626_v58 }
0x157e   :  { %v1650_v60 = vsel %vm528_vm5, %v629_v59, %v1608_v61  ;;  %vm631_vm14 = vcmp.eq.s32.totalorder %v1378_v3, %v629_v59 }
0x157f   :  { %v1225_v6 = vsel %vm631_vm14, 1.0, %v1341_v5  ;;  %vm846_vm14 = vcmp.eq.s32.totalorder %v1378_v3, 7 }
0x1580   :  { %v645_v13 = vsel %vm53_vm1, %v1225_v6, %v639_v1 }
0x1581   :  { %v643_v14 = vpop.permute.xlu2 %642 }
0x1582   :  { %v646_v15 = vsel %vm55_vm2, %v645_v13, %v643_v14 }
0x1583   :  { %v647_v16 = vpack.c.bf16 %v646_v15, %v646_v15 }
0x1585   :  { %656 = vmatmul.bf16.vlgmr.msrb.gmra.mxu0 %v647_v16 }
0x1586   :  { %1072 = vmatpush.bf16.msrb.mxu0 %v1375_v2 }
0x158a   :  { %1073 = vmatpush.bf16.msrb.mxu0 %v1384_v4 }
0x158e   :  { %1074 = vmatpush.bf16.msrb.mxu0 %v1395_v7 }
0x1592   :  { %1075 = vmatpush.bf16.msrb.mxu0 %v1403_v8 }
0x1596   :  { %1076 = vmatpush.bf16.msrb.mxu0 %v1410_v9 }
0x159a   :  { %1077 = vmatpush.bf16.msrb.mxu0 %v1418_v10 }
0x159e   :  { %1078 = vmatpush.bf16.msrb.mxu0 %v1424_v11 }
0x15a2   :  { %1079 = vmatpush.bf16.msrb.mxu0 %v1432_v12 }
0x1602   :  { %v657_v61 = vpop.f32.mrf.mxu0 }
0x1603   :  { %1299 = vtanh.f32 %v657_v61  ;;  %v1227_v0 = vmul.f32 -1.442695, %v657_v61 }
0x1605   :  { %1301 = vpow2.f32 %v1227_v0 }
0x1609   :  { %v1300_v62 = vpop.eup %1299 }
0x160a   :  { %683 = vrot.lane.b32.xlu1 %v1300_v62, %s1340_s19  ;;  %v659_v2 = vpop.f32.mrf.mxu0 }
0x160b   :  { %v1302_v4 = vpop.eup %1301 }
0x160c   :  { %v664_v7 = vadd.f32 1.0, %v1302_v4 }
0x160e   :  { %1303 = vrcp.f32 %v664_v7  ;;  %v676_v11 = vand.u32 2147483648, %v664_v7  ;;  %vm670_vm3 = vweird.f32 %v664_v7  ;;  %v674_v12 = vand.u32 2147483647, %v664_v7 }
0x1610   :  { %v677_v19 = vor.u32 1.1754944e-38, %v676_v11  ;;  %vm675_vm5 = vcmp.eq.f32.partialorder %v674_v12, 8.507059e+37 }
0x1614   :  { %v1304_v8 = vpop.eup %1303 }
0x1615   :  { %v666_v63 = vmul.f32 %v1304_v8, %v664_v7  ;;  %vm671_vm15 = vweird.f32 %v1304_v8 }
0x1616   :  { %vm672_vm4 = vmor %vm670_vm3, %vm671_vm15 }
0x1617   :  { %v667_v9 = vsub.f32 1.0, %v666_v63 }
0x1619   :  { %v668_v17 = vmul.f32 %v1304_v8, %v667_v9 }
0x161b   :  { %v669_v10 = vadd.f32 %v1304_v8, %v668_v17 }
0x161d   :  { %v673_v18 = vsel %vm672_vm4, %v1304_v8, %v669_v10 }
0x161e   :  { %v678_v21 = vsel %vm675_vm5, %v677_v19, %v673_v18 }
0x161f   :  { %v681_v23 = vmul.f32 %v678_v21, %v1625_v34 }
0x167c   :  { %v684_v20 = vpop.permute.xlu1 %683 }
0x167d   :  { %v686_v22 = vmul.f32 %v684_v20, %v678_v21 }
0x167f   :  { %688 = vrot.lane.b32.xlu0 %v686_v22, %s1340_s19 }
0x16f1   :  { %v689_v24 = vpop.permute.xlu0 %688 }
0x16f2   :  { %v1667_v25 = vadd.f32 %v689_v24, %v681_v23 }
0x16f4   :  { %1305 = vtanh.f32 %v1667_v25 }
0x16fa   :  { %v1306_v26 = vpop.eup %1305 }
0x16fb   :  { %694 = vrot.lane.b32.xlu2 %v1306_v26, %s1340_s19 }
0x1755   :  { %v695_v27 = vpop.permute.xlu2 %694 }
0x1756   :  { %v697_v28 = vmul.f32 %v695_v27, %v678_v21  ;;  %v1234_v27 = vsel %vm846_vm14, 1.0, %v1341_v5 }
0x1758   :  { %v698_v29 = vpack.c.bf16 %v697_v28, %v697_v28 }
0x175a   :  { %700 = vrot.lane.b32.xlu0 %v698_v29, %s1342_s23 }
0x17cc   :  { %v701_v30 = vpop.permute.xlu0 %700 }
0x17cd   :  { %1228 = vmatmul.msk.bf16.vlgmr.msrb.gmra.mxu1 %vm53_vm1, %v701_v30 }
0x17ce   :  { %1135 = vmatpush.bf16.msrb.mxu1 %v1463_v40  ;;  %v1230_v40 = vsel %vm740_vm6, 1.0, %v1341_v5 }
0x17d2   :  { %1136 = vmatpush.bf16.msrb.mxu1 %v1469_v41 }
0x184a   :  { %v714_v31 = vpop.f32.mrf.mxu1 }
0x184b   :  { %v715_v32 = vadd.f32 %v714_v31, %v1493_v46 }
0x184d   :  { %718 = vmax.xlane.f32.xlu1 %v715_v32 }
0x1852   :  { %v716_v33 = vpop.f32.mrf.mxu1 }
0x1866   :  { %744 = vrot.lane.b32.xlu1 %v697_v28, %s1343_s12 }
0x18c0   :  { %v719_v34 = vpop.xlane.xlu1 %718 }
0x18c1   :  { %vm720_vm0 = vcmp.eq.f32.partialorder %v715_v32, %v719_v34 }
0x18c2   :  { %v721_v39 = vsel %vm720_vm0, %v1378_v3, 128 }
0x18c3   :  { %v723_v42 = vshra.s32 %v721_v39, 16  ;;  %v722_v41 = vand.u32 65535, %v721_v39 }
0x18c5   :  { %v725_v43 = vcvt.s32.f32 %v723_v42  ;;  %v724_v38 = vcvt.s32.f32 %v722_v41 }
0x18c7   :  { %726 = vmin.xlane.f32.xlu2 %v725_v43 }
0x18d8   :  { %v745_v51 = vpop.permute.xlu1 %744 }
0x18df   :  { %748 = vrot.lane.b32.xlu2 %v1230_v40, %s1342_s23 }
0x193a   :  { %v727_v44 = vpop.xlane.xlu2 %726 }
0x193b   :  { %vm728_vm7 = vcmp.eq.f32.partialorder %v725_v43, %v727_v44  ;;  %v733_v37 = vcvt.f32.s32 %v727_v44 }
0x193c   :  { %v729_v35 = vsel %vm728_vm7, %v724_v38, inf }
0x193d   :  { %730 = vmin.xlane.f32.xlu0 %v729_v35  ;;  %v734_v45 = vshll.u32 %v733_v37, 16 }
0x1942   :  { %v749_v50 = vpop.permute.xlu2 %748 }
0x19b0   :  { %v731_v36 = vpop.xlane.xlu0 %730 }
0x19b1   :  { %v732_v47 = vcvt.f32.s32 %v731_v36 }
0x19b3   :  { %v735_v48 = vadd.s32 %v734_v45, %v732_v47 }
0x19b5   :  { %v1686_v49 = vsel %vm634_vm13, %v735_v48, %v1650_v60  ;;  %vm737_vm8 = vcmp.eq.s32.totalorder %v1378_v3, %v735_v48 }
0x19b6   :  { %v1229_v52 = vsel %vm737_vm8, 1.0, %v1341_v5  ;;  %vm952_vm8 = vcmp.eq.s32.totalorder %v1378_v3, 8 }
0x19b7   :  { %v751_v53 = vsel %vm53_vm1, %v1229_v52, %v745_v51 }
0x19b8   :  { %v752_v54 = vsel %vm55_vm2, %v751_v53, %v749_v50 }
0x19b9   :  { %v753_v55 = vpack.c.bf16 %v752_v54, %v752_v54 }
0x19bb   :  { %762 = vmatmul.bf16.vlgmr.msra.gmra.mxu3 %v753_v55 }
0x1a3e   :  { %v763_v56 = vpop.f32.mrf.mxu3 }
0x1a3f   :  { %1307 = vtanh.f32 %v763_v56  ;;  %v1231_v59 = vmul.f32 -1.442695, %v763_v56 }
0x1a41   :  { %1309 = vpow2.f32 %v1231_v59 }
0x1a45   :  { %v1308_v57 = vpop.eup %1307 }
0x1a46   :  { %789 = vrot.lane.b32.xlu0 %v1308_v57, %s1340_s19  ;;  %v765_v58 = vpop.f32.mrf.mxu3 }
0x1a47   :  { %v1310_v60 = vpop.eup %1309 }
0x1a48   :  { %v770_v1 = vadd.f32 1.0, %v1310_v60 }
0x1a4a   :  { %1311 = vrcp.f32 %v770_v1  ;;  %v782_v61 = vand.u32 2147483648, %v770_v1  ;;  %vm776_vm10 = vweird.f32 %v770_v1  ;;  %v780_v62 = vand.u32 2147483647, %v770_v1 }
0x1a4c   :  { %v783_v0 = vor.u32 1.1754944e-38, %v782_v61  ;;  %vm781_vm12 = vcmp.eq.f32.partialorder %v780_v62, 8.507059e+37 }
0x1a50   :  { %v1312_v6 = vpop.eup %1311 }
0x1a51   :  { %v772_v13 = vmul.f32 %v1312_v6, %v770_v1  ;;  %vm777_vm9 = vweird.f32 %v1312_v6 }
0x1a52   :  { %vm778_vm11 = vmor %vm776_vm10, %vm777_vm9 }
0x1a53   :  { %v773_v14 = vsub.f32 1.0, %v772_v13 }
0x1a55   :  { %v774_v15 = vmul.f32 %v1312_v6, %v773_v14 }
0x1a57   :  { %v775_v16 = vadd.f32 %v1312_v6, %v774_v15 }
0x1a59   :  { %v779_v2 = vsel %vm778_vm11, %v1312_v6, %v775_v16 }
0x1a5a   :  { %v784_v7 = vsel %vm781_vm12, %v783_v0, %v779_v2 }
0x1a5b   :  { %v787_v63 = vmul.f32 %v784_v7, %v1667_v25 }
0x1ab8   :  { %v790_v4 = vpop.permute.xlu0 %789 }
0x1ab9   :  { %v792_v8 = vmul.f32 %v790_v4, %v784_v7  ;;  %v1730_v4 = vld [vmem:[%s1792_s3] sm:$0xff] }
0x1abb   :  { %794 = vrot.lane.b32.xlu1 %v792_v8, %s1340_s19 }
0x1b2d   :  { %v795_v9 = vpop.permute.xlu1 %794 }
0x1b2e   :  { %v1695_v17 = vadd.f32 %v795_v9, %v787_v63 }
0x1b30   :  { %1313 = vtanh.f32 %v1695_v17 }
0x1b36   :  { %v1314_v10 = vpop.eup %1313 }
0x1b37   :  { %800 = vrot.lane.b32.xlu0 %v1314_v10, %s1340_s19 }
0x1ba9   :  { %v801_v11 = vpop.permute.xlu0 %800 }
0x1baa   :  { %v803_v12 = vmul.f32 %v801_v11, %v784_v7  ;;  %v1238_v11 = vsel %vm952_vm8, 1.0, %v1341_v5 }
0x1bac   :  { %v804_v18 = vpack.c.bf16 %v803_v12, %v803_v12 }
0x1bae   :  { %806 = vrot.lane.b32.xlu2 %v804_v18, %s1342_s23 }
0x1c08   :  { %v807_v19 = vpop.permute.xlu2 %806 }
0x1c09   :  { %1232 = vmatmul.msk.bf16.vlgmr.msra.gmra.mxu2 %vm53_vm1, %v807_v19 }
0x1c8c   :  { %v820_v20 = vpop.f32.mrf.mxu2 }
0x1c8d   :  { %v821_v21 = vadd.f32 %v820_v20, %v1493_v46 }
0x1c8f   :  { %824 = vmax.xlane.f32.xlu1 %v821_v21 }
0x1c94   :  { %v822_v22 = vpop.f32.mrf.mxu2 }
0x1ca8   :  { %850 = vrot.lane.b32.xlu1 %v803_v12, %s1343_s12 }
0x1d02   :  { %v825_v23 = vpop.xlane.xlu1 %824 }
0x1d03   :  { %vm826_vm13 = vcmp.eq.f32.partialorder %v821_v21, %v825_v23 }
0x1d04   :  { %v827_v24 = vsel %vm826_vm13, %v1378_v3, 128 }
0x1d05   :  { %v829_v25 = vshra.s32 %v827_v24, 16  ;;  %v828_v46 = vand.u32 65535, %v827_v24 }
0x1d07   :  { %v831_v26 = vcvt.s32.f32 %v829_v25  ;;  %v830_v29 = vcvt.s32.f32 %v828_v46 }
0x1d09   :  { %832 = vmin.xlane.f32.xlu0 %v831_v26 }
0x1d1a   :  { %v851_v40 = vpop.permute.xlu1 %850 }
0x1d1d   :  { %854 = vrot.lane.b32.xlu0 %v1234_v27, %s1342_s23 }
0x1d7c   :  { %v833_v28 = vpop.xlane.xlu0 %832 }
0x1d7d   :  { %vm834_vm15 = vcmp.eq.f32.partialorder %v831_v26, %v833_v28  ;;  %v839_v31 = vcvt.f32.s32 %v833_v28 }
0x1d7e   :  { %v835_v30 = vsel %vm834_vm15, %v830_v29, inf }
0x1d7f   :  { %836 = vmin.xlane.f32.xlu2 %v835_v30  ;;  %v840_v33 = vshll.u32 %v839_v31, 16 }
0x1d8f   :  { %v855_v43 = vpop.permute.xlu0 %854 }
0x1df2   :  { %v837_v32 = vpop.xlane.xlu2 %836 }
0x1df3   :  { %v838_v34 = vcvt.f32.s32 %v837_v32 }
0x1df5   :  { %v841_v39 = vadd.s32 %v840_v33, %v838_v34 }
0x1df7   :  { %v1712_v42 = vsel %vm740_vm6, %v841_v39, %v1686_v49  ;;  %vm843_vm3 = vcmp.eq.s32.totalorder %v1378_v3, %v841_v39 }
0x1df8   :  { %v1233_v41 = vsel %vm843_vm3, 1.0, %v1341_v5  ;;  %vm1058_vm3 = vcmp.eq.s32.totalorder %v1378_v3, 9 }
0x1df9   :  { %v857_v44 = vsel %vm53_vm1, %v1233_v41, %v851_v40 }
0x1dfa   :  { %v858_v38 = vsel %vm55_vm2, %v857_v44, %v855_v43 }
0x1dfb   :  { %v859_v35 = vpack.c.bf16 %v858_v38, %v858_v38 }
0x1dfd   :  { %868 = vmatmul.bf16.vlgmr.msra.gmra.mxu1 %v859_v35 }
0x1e7a   :  { %v869_v37 = vpop.f32.mrf.mxu1 }
0x1e7b   :  { %1315 = vtanh.f32 %v869_v37  ;;  %v1235_v47 = vmul.f32 -1.442695, %v869_v37 }
0x1e7d   :  { %1317 = vpow2.f32 %v1235_v47 }
0x1e81   :  { %v1316_v36 = vpop.eup %1315 }
0x1e82   :  { %895 = vrot.lane.b32.xlu2 %v1316_v36, %s1340_s19  ;;  %v871_v45 = vpop.f32.mrf.mxu1 }
0x1e83   :  { %v1318_v48 = vpop.eup %1317 }
0x1e84   :  { %v876_v49 = vadd.f32 1.0, %v1318_v48 }
0x1e86   :  { %1319 = vrcp.f32 %v876_v49  ;;  %v888_v55 = vand.u32 2147483648, %v876_v49  ;;  %vm882_vm5 = vweird.f32 %v876_v49  ;;  %v886_v56 = vand.u32 2147483647, %v876_v49 }
0x1e88   :  { %v889_v58 = vor.u32 1.1754944e-38, %v888_v55  ;;  %vm887_vm6 = vcmp.eq.f32.partialorder %v886_v56, 8.507059e+37 }
0x1e8c   :  { %v1320_v50 = vpop.eup %1319 }
0x1e8d   :  { %v878_v51 = vmul.f32 %v1320_v50, %v876_v49  ;;  %vm883_vm4 = vweird.f32 %v1320_v50 }
0x1e8e   :  { %vm884_vm0 = vmor %vm882_vm5, %vm883_vm4 }
0x1e8f   :  { %v879_v52 = vsub.f32 1.0, %v878_v51 }
0x1e91   :  { %v880_v53 = vmul.f32 %v1320_v50, %v879_v52 }
0x1e93   :  { %v881_v54 = vadd.f32 %v1320_v50, %v880_v53 }
0x1e95   :  { %v885_v57 = vsel %vm884_vm0, %v1320_v50, %v881_v54 }
0x1e96   :  { %v890_v60 = vsel %vm887_vm6, %v889_v58, %v885_v57 }
0x1e97   :  { %v893_v6 = vmul.f32 %v890_v60, %v1695_v17 }
0x1edc   :  { %v896_v59 = vpop.permute.xlu2 %895 }
0x1edd   :  { %v898_v1 = vmul.f32 %v896_v59, %v890_v60 }
0x1edf   :  { %900 = vrot.lane.b32.xlu0 %v898_v1, %s1340_s19 }
0x1f51   :  { %v901_v13 = vpop.permute.xlu0 %900 }
0x1f52   :  { %v1721_v14 = vadd.f32 %v901_v13, %v893_v6 }
0x1f54   :  { %1321 = vtanh.f32 %v1721_v14 }
0x1f5a   :  { %v1322_v15 = vpop.eup %1321 }
0x1f5b   :  { %906 = vrot.lane.b32.xlu1 %v1322_v15, %s1340_s19 }
0x1fcd   :  { %v907_v16 = vpop.permute.xlu1 %906 }
0x1fce   :  { %v909_v61 = vmul.f32 %v907_v16, %v890_v60  ;;  %v1242_v16 = vsel %vm1058_vm3, 1.0, %v1341_v5 }
0x1fd0   :  { %v910_v62 = vpack.c.bf16 %v909_v61, %v909_v61 }
0x1fd2   :  { %912 = vrot.lane.b32.xlu2 %v910_v62, %s1342_s23 }
0x202c   :  { %v913_v2 = vpop.permute.xlu2 %912 }
0x202d   :  { %1236 = vmatmul.msk.bf16.vlgmr.msra.gmra.mxu0 %vm53_vm1, %v913_v2 }
0x20aa   :  { %v926_v0 = vpop.f32.mrf.mxu0 }
0x20ab   :  { %v927_v7 = vadd.f32 %v1730_v4, %v926_v0 }
0x20ad   :  { %930 = vmax.xlane.f32.xlu0 %v927_v7 }
0x20b2   :  { %v928_v8 = vpop.f32.mrf.mxu0 }
0x20c1   :  { %956 = vrot.lane.b32.xlu0 %v909_v61, %s1343_s12 }
0x2120   :  { %v931_v63 = vpop.xlane.xlu0 %930 }
0x2121   :  { %vm932_vm7 = vcmp.eq.f32.partialorder %v927_v7, %v931_v63 }
0x2122   :  { %v933_v9 = vsel %vm932_vm7, %v1378_v3, 128 }
0x2123   :  { %v935_v17 = vshra.s32 %v933_v9, 16  ;;  %v934_v12 = vand.u32 65535, %v933_v9 }
0x2125   :  { %v937_v10 = vcvt.s32.f32 %v935_v17  ;;  %v936_v19 = vcvt.s32.f32 %v934_v12 }
0x2127   :  { %938 = vmin.xlane.f32.xlu1 %v937_v10 }
0x2133   :  { %v957_v46 = vpop.permute.xlu0 %956 }
0x2140   :  { %960 = vrot.lane.b32.xlu1 %v1238_v11, %s1342_s23 }
0x219a   :  { %v939_v18 = vpop.xlane.xlu1 %938 }
0x219b   :  { %vm940_vm9 = vcmp.eq.f32.partialorder %v937_v10, %v939_v18  ;;  %v945_v21 = vcvt.f32.s32 %v939_v18 }
0x219c   :  { %v941_v20 = vsel %vm940_vm9, %v936_v19, inf }
0x219d   :  { %942 = vmin.xlane.f32.xlu2 %v941_v20  ;;  %v946_v23 = vshll.u32 %v945_v21, 16 }
0x21b2   :  { %v961_v27 = vpop.permute.xlu1 %960 }
0x2210   :  { %v943_v22 = vpop.xlane.xlu2 %942 }
0x2211   :  { %v944_v24 = vcvt.f32.s32 %v943_v22 }
0x2213   :  { %v947_v25 = vadd.s32 %v946_v23, %v944_v24 }
0x2215   :  { %v1743_v26 = vsel %vm846_vm14, %v947_v25, %v1712_v42  ;;  %vm949_vm10 = vcmp.eq.s32.totalorder %v1378_v3, %v947_v25 }
0x2216   :  { %v1237_v28 = vsel %vm949_vm10, 1.0, %v1341_v5 }
0x2217   :  { %v963_v29 = vsel %vm53_vm1, %v1237_v28, %v957_v46 }
0x2218   :  { %v964_v30 = vsel %vm55_vm2, %v963_v29, %v961_v27 }
0x2219   :  { %v965_v31 = vpack.c.bf16 %v964_v30, %v964_v30 }
0x221b   :  { %974 = vmatmul.bf16.vlgmr.msrb.gmra.mxu2 %v965_v31 }
0x229e   :  { %v975_v32 = vpop.f32.mrf.mxu2 }
0x229f   :  { %1323 = vtanh.f32 %v975_v32  ;;  %v1239_v39 = vmul.f32 -1.442695, %v975_v32 }
0x22a1   :  { %1325 = vpow2.f32 %v1239_v39 }
0x22a5   :  { %v1324_v33 = vpop.eup %1323 }
0x22a6   :  { %1001 = vrot.lane.b32.xlu2 %v1324_v33, %s1340_s19  ;;  %v977_v34 = vpop.f32.mrf.mxu2 }
0x22a7   :  { %v1326_v42 = vpop.eup %1325 }
0x22a8   :  { %v982_v43 = vadd.f32 1.0, %v1326_v42 }
0x22aa   :  { %1327 = vrcp.f32 %v982_v43  ;;  %v994_v37 = vand.u32 2147483648, %v982_v43  ;;  %vm988_vm12 = vweird.f32 %v982_v43  ;;  %v992_v36 = vand.u32 2147483647, %v982_v43 }
0x22ac   :  { %v995_v47 = vor.u32 1.1754944e-38, %v994_v37  ;;  %vm993_vm14 = vcmp.eq.f32.partialorder %v992_v36, 8.507059e+37 }
0x22b0   :  { %v1328_v40 = vpop.eup %1327 }
0x22b1   :  { %v984_v41 = vmul.f32 %v1328_v40, %v982_v43  ;;  %vm989_vm11 = vweird.f32 %v1328_v40 }
0x22b2   :  { %vm990_vm13 = vmor %vm988_vm12, %vm989_vm11 }
0x22b3   :  { %v985_v44 = vsub.f32 1.0, %v984_v41 }
0x22b5   :  { %v986_v38 = vmul.f32 %v1328_v40, %v985_v44 }
0x22b7   :  { %v987_v35 = vadd.f32 %v1328_v40, %v986_v38 }
0x22b9   :  { %v991_v45 = vsel %vm990_vm13, %v1328_v40, %v987_v35 }
0x22ba   :  { %v996_v49 = vsel %vm993_vm14, %v995_v47, %v991_v45 }
0x22bb   :  { %v999_v51 = vmul.f32 %v996_v49, %v1721_v14 }
0x2300   :  { %v1002_v48 = vpop.permute.xlu2 %1001 }
0x2301   :  { %v1004_v50 = vmul.f32 %v1002_v48, %v996_v49 }
0x2303   :  { %1006 = vrot.lane.b32.xlu0 %v1004_v50, %s1340_s19 }
0x2375   :  { %v1007_v52 = vpop.permute.xlu0 %1006 }
0x2376   :  { %v1752_v53 = vadd.f32 %v1007_v52, %v999_v51 }
0x2378   :  { %1329 = vtanh.f32 %v1752_v53 }
0x237e   :  { %v1330_v54 = vpop.eup %1329 }
0x237f   :  { %1012 = vrot.lane.b32.xlu0 %v1330_v54, %s1340_s19 }
0x23f1   :  { %v1013_v55 = vpop.permute.xlu0 %1012 }
0x23f2   :  { %v1015_v56 = vmul.f32 %v1013_v55, %v996_v49 }
0x23f4   :  { %v1016_v57 = vpack.c.bf16 %v1015_v56, %v1015_v56 }
0x23f6   :  { %1018 = vrot.lane.b32.xlu1 %v1016_v57, %s1342_s23 }
0x2468   :  { %v1019_v58 = vpop.permute.xlu1 %1018 }
0x2469   :  { %1240 = vmatmul.msk.bf16.vlgmr.msrb.gmra.mxu3 %vm53_vm1, %v1019_v58 }
0x24ec   :  { %v1032_v59 = vpop.f32.mrf.mxu3 }
0x24ed   :  { %v1033_v60 = vadd.f32 %v1730_v4, %v1032_v59 }
0x24ef   :  { %1036 = vmax.xlane.f32.xlu2 %v1033_v60 }
0x24f4   :  { %v1034_v1 = vpop.f32.mrf.mxu3 }
0x2507   :  { %1062 = vrot.lane.b32.xlu2 %v1015_v56, %s1343_s12 }
0x2562   :  { %v1037_v6 = vpop.xlane.xlu2 %1036 }
0x2563   :  { %vm1038_vm15 = vcmp.eq.f32.partialorder %v1033_v60, %v1037_v6 }
0x2564   :  { %v1039_v13 = vsel %vm1038_vm15, %v1378_v3, 128 }
0x2565   :  { %v1041_v14 = vshra.s32 %v1039_v13, 16  ;;  %v1040_v61 = vand.u32 65535, %v1039_v13 }
0x2567   :  { %v1043_v15 = vcvt.s32.f32 %v1041_v14  ;;  %v1042_v2 = vcvt.s32.f32 %v1040_v61 }
0x2569   :  { %1044 = vmin.xlane.f32.xlu0 %v1043_v15 }
0x256a   :  { %v1063_v12 = vpop.permute.xlu2 %1062 }
0x257d   :  { %1066 = vrot.lane.b32.xlu0 %v1242_v16, %s1342_s23 }
0x25dc   :  { %v1045_v62 = vpop.xlane.xlu0 %1044 }
0x25dd   :  { %vm1046_vm4 = vcmp.eq.f32.partialorder %v1043_v15, %v1045_v62  ;;  %v1051_v7 = vcvt.f32.s32 %v1045_v62 }
0x25de   :  { %v1047_v0 = vsel %vm1046_vm4, %v1042_v2, inf }
0x25df   :  { %1048 = vmin.xlane.f32.xlu1 %v1047_v0  ;;  %v1052_v63 = vshll.u32 %v1051_v7, 16 }
0x25ef   :  { %v1067_v11 = vpop.permute.xlu0 %1066 }
0x2652   :  { %v1049_v8 = vpop.xlane.xlu1 %1048 }
0x2653   :  { %v1050_v9 = vcvt.f32.s32 %v1049_v8 }
0x2655   :  { %v1053_v17 = vadd.s32 %v1052_v63, %v1050_v9 }
0x2657   :  { %v1769_v10 = vsel %vm952_vm8, %v1053_v17, %v1743_v26  ;;  %vm1055_vm5 = vcmp.eq.s32.totalorder %v1378_v3, %v1053_v17 }
0x2658   :  { %v1241_v18 = vsel %vm1055_vm5, 1.0, %v1341_v5 }
0x2659   :  { %v1069_v19 = vsel %vm53_vm1, %v1241_v18, %v1063_v12 }
0x265a   :  { %v1070_v20 = vsel %vm55_vm2, %v1069_v19, %v1067_v11 }
0x265b   :  { %v1071_v21 = vpack.c.bf16 %v1070_v20, %v1070_v20 }
0x265d   :  { %1080 = vmatmul.bf16.vlgmr.msrb.gmra.mxu0 %v1071_v21 }
0x26da   :  { %v1081_v22 = vpop.f32.mrf.mxu0 }
0x26db   :  { %1331 = vtanh.f32 %v1081_v22  ;;  %v1243_v25 = vmul.f32 -1.442695, %v1081_v22 }
0x26dd   :  { %1333 = vpow2.f32 %v1243_v25 }
0x26e1   :  { %v1332_v23 = vpop.eup %1331 }
0x26e2   :  { %1107 = vrot.lane.b32.xlu1 %v1332_v23, %s1340_s19  ;;  %v1083_v24 = vpop.f32.mrf.mxu0 }
0x26e3   :  { %v1334_v26 = vpop.eup %1333 }
0x26e4   :  { %v1088_v27 = vadd.f32 1.0, %v1334_v26 }
0x26e6   :  { %1335 = vrcp.f32 %v1088_v27  ;;  %v1100_v31 = vand.u32 2147483648, %v1088_v27  ;;  %vm1094_vm2 = vweird.f32 %v1088_v27  ;;  %v1098_v32 = vand.u32 2147483647, %v1088_v27 }
0x26e8   :  { %v1101_v34 = vor.u32 1.1754944e-38, %v1100_v31  ;;  %vm1099_vm7 = vcmp.eq.f32.partialorder %v1098_v32, 8.507059e+37 }
0x26ec   :  { %v1336_v46 = vpop.eup %1335 }
0x26ed   :  { %v1090_v28 = vmul.f32 %v1336_v46, %v1088_v27  ;;  %vm1095_vm0 = vweird.f32 %v1336_v46 }
0x26ee   :  { %vm1096_vm6 = vmor %vm1094_vm2, %vm1095_vm0 }
0x26ef   :  { %v1091_v5 = vsub.f32 1.0, %v1090_v28 }
0x26f1   :  { %v1092_v29 = vmul.f32 %v1336_v46, %v1091_v5 }
0x26f3   :  { %v1093_v30 = vadd.f32 %v1336_v46, %v1092_v29 }
0x26f5   :  { %v1097_v33 = vsel %vm1096_vm6, %v1336_v46, %v1093_v30 }
0x26f6   :  { %v1102_v42 = vsel %vm1099_vm7, %v1101_v34, %v1097_v33 }
0x26f7   :  { %v1105_v40 = vmul.f32 %v1102_v42, %v1752_v53 }
0x2754   :  { %v1108_v39 = vpop.permute.xlu1 %1107 }
0x2755   :  { %v1110_v43 = vmul.f32 %v1108_v39, %v1102_v42 }
0x2757   :  { %1112 = vrot.lane.b32.xlu2 %v1110_v43, %s1340_s19 }
0x27b1   :  { %v1113_v41 = vpop.permute.xlu2 %1112 }
0x27b2   :  { %v1115_v44 = vadd.f32 %v1113_v41, %v1105_v40 }
0x27b4   :  { %1337 = vtanh.f32 %v1115_v44 }
0x27ba   :  { %v1338_v38 = vpop.eup %1337 }
0x27bb   :  { %1118 = vrot.lane.b32.xlu0 %v1338_v38, %s1340_s19 }
0x282d   :  { %v1119_v35 = vpop.permute.xlu0 %1118 }
0x282e   :  { %v1121_v37 = vmul.f32 %v1119_v35, %v1102_v42 }
0x2830   :  { %v1122_v36 = vpack.c.bf16 %v1121_v37, %v1121_v37 }
0x2832   :  { %1124 = vrot.lane.b32.xlu2 %v1122_v36, %s1342_s23 }
0x288c   :  { %v1125_v45 = vpop.permute.xlu2 %1124 }
0x288d   :  { %1244 = vmatmul.msk.bf16.vlgmr.msrb.gmra.mxu1 %vm53_vm1, %v1125_v45 }
0x290a   :  { %v1138_v47 = vpop.f32.mrf.mxu1 }
0x290b   :  { %v1139_v48 = vadd.f32 %v1730_v4, %v1138_v47 }
0x290d   :  { %1142 = vmax.xlane.f32.xlu1 %v1139_v48 }
0x2912   :  { %v1140_v49 = vpop.f32.mrf.mxu1 }
0x2980   :  { %v1143_v50 = vpop.xlane.xlu1 %1142 }
0x2981   :  { %vm1144_vm8 = vcmp.eq.f32.partialorder %v1139_v48, %v1143_v50 }
0x2982   :  { %v1145_v51 = vsel %vm1144_vm8, %v1378_v3, 128 }
0x2983   :  { %v1147_v52 = vshra.s32 %v1145_v51, 16  ;;  %v1146_v54 = vand.u32 65535, %v1145_v51 }
0x2985   :  { %v1149_v53 = vcvt.s32.f32 %v1147_v52  ;;  %v1148_v56 = vcvt.s32.f32 %v1146_v54 }
0x2987   :  { %1150 = vmin.xlane.f32.xlu0 %v1149_v53 }
0x29fa   :  { %v1151_v55 = vpop.xlane.xlu0 %1150 }
0x29fb   :  { %vm1152_vm9 = vcmp.eq.f32.partialorder %v1149_v53, %v1151_v55  ;;  %v1157_v58 = vcvt.f32.s32 %v1151_v55 }
0x29fc   :  { %v1153_v57 = vsel %vm1152_vm9, %v1148_v56, inf }
0x29fd   :  { %1154 = vmin.xlane.f32.xlu2 %v1153_v57  ;;  %v1158_v60 = vshll.u32 %v1157_v58, 16 }
0x2a70   :  { %v1155_v59 = vpop.xlane.xlu2 %1154 }
0x2a71   :  { %v1156_v1 = vcvt.f32.s32 %v1155_v59 }
0x2a73   :  { %v1159_v4 = vadd.s32 %v1158_v60, %v1156_v1 }
0x2a75   :  { %v1160_v6 = vsel %vm1058_vm3, %v1159_v4, %v1769_v10 }
0x2a76   :  { %1161 = vst [vmem:[%s1793_s4] sm:$0xff] %v1160_v6 }

</bundles_post_ra>
